<compile_context>
chip_gen: v6e
topology: v6e:2x2x1
jax: 0.10.0
libtpu: 0.0.40
codegen_flags: <defaults>
</compile_context>

<pallas_src>
import functools

import jax
import jax.numpy as jnp
from jax.experimental import pallas as pl
from jax.experimental.pallas import tpu as pltpu

BN_EPS = 1e-5
LANES = 128
TILE_M_DEFAULT = 4096                     # rows of M = N*D*H*W per grid step
VMEM_BUDGET_BYTES = 40 * 1024 * 1024      # working-set cap (safe on v7x 64 MiB)
VMEM_LIMIT_BYTES = 48 * 1024 * 1024       # scoped VMEM limit for both passes


def _round_up(x, m):
    return (x + m - 1) // m * m


def _stats_kernel(p_ref, w_ref, stats_ref):
    """Pass 1: one bf16 MXU matmul per M tile, emit per-tile BN partials.

    p_ref:     (TILE_M, Kp)   bf16 im2col patch tile (taps folded into K)
    w_ref:     (Kp, COUTP)    bf16 folded weights (constant index_map -> resident)
    stats_ref: (8, COUTP) f32 row 0 = per-channel sum over this tile,
                              row 1 = per-channel sum of squares, rows 2-7 = 0.
    """
    acc = jnp.dot(p_ref[...], w_ref[...], preferred_element_type=jnp.float32)
    stats_ref[...] = jnp.zeros_like(stats_ref)
    stats_ref[0:1, :] = jnp.sum(acc, axis=0, keepdims=True)
    stats_ref[1:2, :] = jnp.sum(acc * acc, axis=0, keepdims=True)


def _conv_bn_relu6_kernel(p_ref, w_ref, scale_ref, shift_ref, out_ref):
    """Pass 2: recompute conv tile from resident bf16 weight, fuse BN + ReLU6.

    out = clip(dot(p, w) * scale + shift, 0, 6), fully lane-dense (COUTP=128k).
    """
    acc = jnp.dot(p_ref[...], w_ref[...], preferred_element_type=jnp.float32)
    y = acc * scale_ref[...] + shift_ref[...]
    out_ref[...] = jnp.clip(y, 0.0, 6.0)


def conv_block_3d(x_ncdhw, weight, kernel_size, *, tile_m=TILE_M_DEFAULT):
    """Forward of ConvBlock3D.

    x_ncdhw : (N, Cin, D, H, W) float32 (PyTorch layout)
    weight  : (Cout, Cin, KD, KH, KW)   (PyTorch Conv3d weight, bias=False)
    returns : (N, Cout, D, H, W) float32
    """
    N, Cin, D, H, W = x_ncdhw.shape
    Cout = weight.shape[0]
    KD, KH, KW = kernel_size
    assert KD % 2 == 1 and KH % 2 == 1 and KW % 2 == 1, "odd kernels for 'same'"
    pd, ph, pw = KD // 2, KH // 2, KW // 2
    K = KD * KH * KW * Cin
    M = N * D * H * W

    Kp = _round_up(K, LANES)
    COUTP = _round_up(Cout, LANES)

    # ---- tile_m selection: VMEM-budgeted, prefer >= 2 grid steps ------------
    # Steady-state per-row bytes: double-buffered bf16 patch tile + double-
    # buffered f32 output tile.  Resident: bf16 weight + scale/shift + stats.
    row_bytes = 2 * Kp * 2 + 2 * COUTP * 4
    resident_bytes = 2 * Kp * COUTP * 2 + 4 * 8 * COUTP * 4
    vmem_cap_rows = max(8, ((VMEM_BUDGET_BYTES - resident_bytes) // row_bytes) // 8 * 8)
    tile_m = min(tile_m, vmem_cap_rows, _round_up(M, 8))
    # v7x megacore: keep >= 2 grid steps whenever each tile still gets >= 512
    # rows (no-op on single-TC v5e/v6e, avoids an idle core on v7x).
    if _round_up(M, tile_m) // tile_m < 2 and M >= 1024:
        tile_m = _round_up((M + 1) // 2, 8)
    Mp = _round_up(M, tile_m)
    n_tiles = Mp // tile_m

    # ---- glue: NDHWC + folded im2col as one lane-dense bf16 (Mp, Kp) slab ---
    x = jnp.transpose(x_ncdhw, (0, 2, 3, 4, 1)).astype(jnp.bfloat16)   # NDHWC
    xp = jnp.pad(x, ((0, 0), (pd, pd), (ph, ph), (pw, pw), (0, 0)))
    cols = []
    for kd in range(KD):
        for kh in range(KH):
            for kw in range(KW):
                cols.append(
                    xp[:, kd:kd + D, kh:kh + H, kw:kw + W, :].reshape(M, Cin)
                )
    patches = jnp.concatenate(cols, axis=-1)                    # (M, K) bf16
    patches = jnp.pad(patches, ((0, Mp - M), (0, Kp - K)))      # (Mp, Kp)
    # TODO(synk): replace this host-side KD*KH*KW im2col slab with in-kernel
    # halo DMA + VMEM tap formation for production shapes.

    # PyTorch weight (Cout, Cin, KD, KH, KW) -> (K, Cout) with K ordered as
    # (kd, kh, kw, cin) to match the patch layout; zero-pad, cast to bf16.
    w_fold = jnp.transpose(weight, (2, 3, 4, 1, 0)).reshape(K, Cout)
    w_fold = jnp.pad(w_fold, ((0, Kp - K), (0, COUTP - Cout)))
    w_fold = w_fold.astype(jnp.bfloat16)                        # (Kp, COUTP)

    # ---- pass 1: per-tile BN partial sums only (no conv writeback) ----------
    stats = pl.pallas_call(
        _stats_kernel,
        out_shape=jax.ShapeDtypeStruct((n_tiles * 8, COUTP), jnp.float32),
        grid_spec=pltpu.PrefetchScalarGridSpec(
            num_scalar_prefetch=0,
            grid=(n_tiles,),
            in_specs=[
                pl.BlockSpec((tile_m, Kp), lambda m: (m, 0)),
                pl.BlockSpec((Kp, COUTP), lambda m: (0, 0)),    # resident
            ],
            out_specs=pl.BlockSpec((8, COUTP), lambda m: (m, 0)),
        ),
        compiler_params=pltpu.CompilerParams(
            dimension_semantics=("parallel",),
            vmem_limit_bytes=VMEM_LIMIT_BYTES,
        ),
    )(patches, w_fold)

    # ---- tiny reduction: batch statistics over the true M rows --------------
    # Zero-padded rows (>= M) contribute 0 to sum / sumsq, so dividing by the
    # true M is exact.
    # TODO(synk): E[x^2]-E[x]^2 in f32 cancels when |mean| >> std at very
    # large M; switch to a Welford-style per-tile combine for production.
    stats = stats.reshape(n_tiles, 8, COUTP)
    total_sum = jnp.sum(stats[:, 0, :], axis=0)
    total_sumsq = jnp.sum(stats[:, 1, :], axis=0)
    m_f = jnp.float32(M)
    mean = total_sum / m_f
    var = jnp.maximum(total_sumsq / m_f - mean * mean, 0.0)
    inv_std = jax.lax.rsqrt(var + BN_EPS)
    scale = inv_std.reshape(1, COUTP)
    shift = (-mean * inv_std).reshape(1, COUTP)

    # ---- pass 2: recompute conv + normalize + ReLU6 (single output stream) --
    out_flat = pl.pallas_call(
        _conv_bn_relu6_kernel,
        out_shape=jax.ShapeDtypeStruct((Mp, COUTP), jnp.float32),
        grid_spec=pltpu.PrefetchScalarGridSpec(
            num_scalar_prefetch=0,
            grid=(n_tiles,),
            in_specs=[
                pl.BlockSpec((tile_m, Kp), lambda m: (m, 0)),
                pl.BlockSpec((Kp, COUTP), lambda m: (0, 0)),    # resident
                pl.BlockSpec((1, COUTP), lambda m: (0, 0)),     # scale
                pl.BlockSpec((1, COUTP), lambda m: (0, 0)),     # shift
            ],
            out_specs=pl.BlockSpec((tile_m, COUTP), lambda m: (m, 0)),
        ),
        compiler_params=pltpu.CompilerParams(
            dimension_semantics=("parallel",),
            vmem_limit_bytes=VMEM_LIMIT_BYTES,
        ),
    )(patches, w_fold, scale, shift)

    # ---- glue: slice padding off, back to PyTorch NCDHW ---------------------
    out = out_flat[:M, :Cout].reshape(N, D, H, W, Cout)
    return jnp.transpose(out, (0, 4, 1, 2, 3)).astype(x_ncdhw.dtype)


def _reference(x_ncdhw, weight):
    """Pure-JAX reference: conv3d + BatchNorm3d(train stats) + ReLU6."""
    conv = jax.lax.conv_general_dilated(
        x_ncdhw, weight,
        window_strides=(1, 1, 1),
        padding="SAME",
        dimension_numbers=("NCDHW", "OIDHW", "NCDHW"),
        precision=jax.lax.Precision.HIGHEST,
    )
    mean = jnp.mean(conv, axis=(0, 2, 3, 4), keepdims=True)
    var = jnp.mean((conv - mean) ** 2, axis=(0, 2, 3, 4), keepdims=True)
    y = (conv - mean) * jax.lax.rsqrt(var + BN_EPS)
    return jnp.clip(y, 0.0, 6.0)


if __name__ == "__main__":
    # Small shapes consistent with ConvBlock3D(in=4, out=8, kernel_size=3).
    N, Cin, Cout = 2, 4, 8
    D = H = W = 8
    kernel_size = (3, 3, 3)

    key = jax.random.PRNGKey(0)
    kx, kw = jax.random.split(key)
    x = jax.random.normal(kx, (N, Cin, D, H, W), dtype=jnp.float32)
    fan_in = Cin * kernel_size[0] * kernel_size[1] * kernel_size[2]
    weight = jax.random.normal(
        kw, (Cout, Cin) + kernel_size, dtype=jnp.float32
    ) * (1.0 / jnp.sqrt(fan_in))

    fwd = jax.jit(functools.partial(conv_block_3d, kernel_size=kernel_size))
    out = jax.block_until_ready(fwd(x, weight))

    ref = _reference(x, weight)
    assert out.shape == (N, Cout, D, H, W)
    assert bool(jnp.all(jnp.isfinite(out)))
    # Deliberate accuracy tradeoff (documented): patches/weights are bf16
    # (MXU-native) with f32 accumulation, compared against an f32 HIGHEST
    # reference -> allow ~3e-2 of rounding headroom.
    assert bool(jnp.allclose(out, ref, atol=3e-2, rtol=3e-2))

    print("KERNEL_OK")
</pallas_src>

<mosaic_0001>
module attributes {stable_mosaic.version = 11 : i64} {
  func.func @_stats_kernel(%arg0: i32, %arg1: memref<512x128xbf16, #tpu.memory_space<vmem>>, %arg2: memref<128x128xbf16, #tpu.memory_space<vmem>>, %arg3: memref<8x128xf32, #tpu.memory_space<vmem>>) attributes {dimension_semantics = [#tpu.dimension_semantics<parallel>], iteration_bounds = array<i64: 2>, scalar_prefetch = 0 : i64, scratch_operands = 0 : i64, tpu.core_type = #tpu.core_type<tc>, window_params = [{transform_indices = @transform_0, window_bounds = array<i64: 512, 128>}, {pipeline_mode = #tpu.pipeline_mode<synchronous>, transform_indices = @transform_1, window_bounds = array<i64: 128, 128>}, {transform_indices = @transform_2, window_bounds = array<i64: 8, 128>}]} {
    %c0 = arith.constant 0 : index
    %c0_0 = arith.constant 0 : index
    %0 = vector.load %arg1[%c0, %c0_0] : memref<512x128xbf16, #tpu.memory_space<vmem>>, vector<512x128xbf16>
    %c0_1 = arith.constant 0 : index
    %c0_2 = arith.constant 0 : index
    %1 = vector.load %arg2[%c0_1, %c0_2] : memref<128x128xbf16, #tpu.memory_space<vmem>>, vector<128x128xbf16>
    %cst = arith.constant dense<0.000000e+00> : vector<512x128xf32>
    %2 = tpu.matmul %0, %1, %cst {dimension_numbers = #tpu.dot_dimension_numbers<[1], [0], [0], [1], [0, 0, 1, 1], [], []>} : vector<512x128xbf16>, vector<128x128xbf16>, vector<512x128xf32> -> vector<512x128xf32>
    %cst_3 = arith.constant 0.000000e+00 : f32
    %3 = vector.broadcast %cst_3 : f32 to vector<8x128xf32>
    %c0_4 = arith.constant 0 : index
    %c0_5 = arith.constant 0 : index
    %4 = vector.load %arg3[%c0_4, %c0_5] : memref<8x128xf32, #tpu.memory_space<vmem>>, vector<8x128xf32>
    tpu.vector_store %arg3[%c0_4, %c0_5], %3 {strides = array<i32>} : memref<8x128xf32, #tpu.memory_space<vmem>>, vector<8x128xf32>,
    %cst_6 = arith.constant dense<0.000000e+00> : vector<128xf32>
    %5 = vector.multi_reduction <add>, %2, %cst_6 [0] : vector<512x128xf32> to vector<128xf32>
    %6 = vector.shape_cast %5 : vector<128xf32> to vector<1x128xf32>
    %c0_7 = arith.constant 0 : index
    %c0_8 = arith.constant 0 : index
    %7 = vector.load %arg3[%c0_7, %c0_8] : memref<8x128xf32, #tpu.memory_space<vmem>>, vector<1x128xf32>
    tpu.vector_store %arg3[%c0_7, %c0_8], %6 {strides = array<i32>} : memref<8x128xf32, #tpu.memory_space<vmem>>, vector<1x128xf32>,
    %8 = arith.mulf %2, %2 : vector<512x128xf32>
    %cst_9 = arith.constant dense<0.000000e+00> : vector<128xf32>
    %9 = vector.multi_reduction <add>, %8, %cst_9 [0] : vector<512x128xf32> to vector<128xf32>
    %10 = vector.shape_cast %9 : vector<128xf32> to vector<1x128xf32>
    %c1 = arith.constant 1 : index
    %c0_10 = arith.constant 0 : index
    %11 = vector.load %arg3[%c1, %c0_10] : memref<8x128xf32, #tpu.memory_space<vmem>>, vector<1x128xf32>
    tpu.vector_store %arg3[%c1, %c0_10], %10 {strides = array<i32>} : memref<8x128xf32, #tpu.memory_space<vmem>>, vector<1x128xf32>,
    return
  }
  func.func @transform_0(%arg0: i32) -> (i32, i32) {
    %c0_i32 = arith.constant 0 : i32
    %c0_i32_0 = arith.constant 0 : i32
    return %arg0, %c0_i32 : i32, i32
  }
  func.func @transform_1(%arg0: i32) -> (i32, i32) {
    %c0_i32 = arith.constant 0 : i32
    %c0_i32_0 = arith.constant 0 : i32
    %c0_i32_1 = arith.constant 0 : i32
    return %c0_i32, %c0_i32_0 : i32, i32
  }
  func.func @transform_2(%arg0: i32) -> (i32, i32) {
    %c0_i32 = arith.constant 0 : i32
    %c0_i32_0 = arith.constant 0 : i32
    return %arg0, %c0_i32 : i32, i32
  }
}

module attributes {stable_mosaic.version = 11 : i64} {
  func.func @_conv_bn_relu6_kernel(%arg0: i32, %arg1: memref<512x128xbf16, #tpu.memory_space<vmem>>, %arg2: memref<128x128xbf16, #tpu.memory_space<vmem>>, %arg3: memref<1x128xf32, #tpu.memory_space<vmem>>, %arg4: memref<1x128xf32, #tpu.memory_space<vmem>>, %arg5: memref<512x128xf32, #tpu.memory_space<vmem>>) attributes {dimension_semantics = [#tpu.dimension_semantics<parallel>], iteration_bounds = array<i64: 2>, scalar_prefetch = 0 : i64, scratch_operands = 0 : i64, tpu.core_type = #tpu.core_type<tc>, window_params = [{transform_indices = @transform_0, window_bounds = array<i64: 512, 128>}, {pipeline_mode = #tpu.pipeline_mode<synchronous>, transform_indices = @transform_1, window_bounds = array<i64: 128, 128>}, {pipeline_mode = #tpu.pipeline_mode<synchronous>, transform_indices = @transform_2, window_bounds = array<i64: 1, 128>}, {pipeline_mode = #tpu.pipeline_mode<synchronous>, transform_indices = @transform_3, window_bounds = array<i64: 1, 128>}, {transform_indices = @transform_4, window_bounds = array<i64: 512, 128>}]} {
    %c0 = arith.constant 0 : index
    %c0_0 = arith.constant 0 : index
    %0 = vector.load %arg1[%c0, %c0_0] : memref<512x128xbf16, #tpu.memory_space<vmem>>, vector<512x128xbf16>
    %c0_1 = arith.constant 0 : index
    %c0_2 = arith.constant 0 : index
    %1 = vector.load %arg2[%c0_1, %c0_2] : memref<128x128xbf16, #tpu.memory_space<vmem>>, vector<128x128xbf16>
    %cst = arith.constant dense<0.000000e+00> : vector<512x128xf32>
    %2 = tpu.matmul %0, %1, %cst {dimension_numbers = #tpu.dot_dimension_numbers<[1], [0], [0], [1], [0, 0, 1, 1], [], []>} : vector<512x128xbf16>, vector<128x128xbf16>, vector<512x128xf32> -> vector<512x128xf32>
    %c0_3 = arith.constant 0 : index
    %c0_4 = arith.constant 0 : index
    %3 = vector.load %arg3[%c0_3, %c0_4] : memref<1x128xf32, #tpu.memory_space<vmem>>, vector<1x128xf32>
    %4 = vector.broadcast %3 : vector<1x128xf32> to vector<512x128xf32>
    %5 = arith.mulf %2, %4 : vector<512x128xf32>
    %c0_5 = arith.constant 0 : index
    %c0_6 = arith.constant 0 : index
    %6 = vector.load %arg4[%c0_5, %c0_6] : memref<1x128xf32, #tpu.memory_space<vmem>>, vector<1x128xf32>
    %7 = vector.broadcast %6 : vector<1x128xf32> to vector<512x128xf32>
    %8 = arith.addf %5, %7 : vector<512x128xf32>
    %cst_7 = arith.constant 0.000000e+00 : f32
    %cst_8 = arith.constant 6.000000e+00 : f32
    %9 = vector.broadcast %cst_7 : f32 to vector<512x128xf32>
    %10 = arith.maximumf %9, %8 : vector<512x128xf32>
    %11 = vector.broadcast %cst_8 : f32 to vector<512x128xf32>
    %12 = arith.minimumf %11, %10 : vector<512x128xf32>
    %c0_9 = arith.constant 0 : index
    %c0_10 = arith.constant 0 : index
    %13 = vector.load %arg5[%c0_9, %c0_10] : memref<512x128xf32, #tpu.memory_space<vmem>>, vector<512x128xf32>
    tpu.vector_store %arg5[%c0_9, %c0_10], %12 {strides = array<i32>} : memref<512x128xf32, #tpu.memory_space<vmem>>, vector<512x128xf32>,
    return
  }
  func.func @transform_0(%arg0: i32) -> (i32, i32) {
    %c0_i32 = arith.constant 0 : i32
    %c0_i32_0 = arith.constant 0 : i32
    return %arg0, %c0_i32 : i32, i32
  }
  func.func @transform_1(%arg0: i32) -> (i32, i32) {
    %c0_i32 = arith.constant 0 : i32
    %c0_i32_0 = arith.constant 0 : i32
    %c0_i32_1 = arith.constant 0 : i32
    return %c0_i32, %c0_i32_0 : i32, i32
  }
  func.func @transform_2(%arg0: i32) -> (i32, i32) {
    %c0_i32 = arith.constant 0 : i32
    %c0_i32_0 = arith.constant 0 : i32
    %c0_i32_1 = arith.constant 0 : i32
    return %c0_i32, %c0_i32_0 : i32, i32
  }
  func.func @transform_3(%arg0: i32) -> (i32, i32) {
    %c0_i32 = arith.constant 0 : i32
    %c0_i32_0 = arith.constant 0 : i32
    %c0_i32_1 = arith.constant 0 : i32
    return %c0_i32, %c0_i32_0 : i32, i32
  }
  func.func @transform_4(%arg0: i32) -> (i32, i32) {
    %c0_i32 = arith.constant 0 : i32
    %c0_i32_0 = arith.constant 0 : i32
    return %arg0, %c0_i32 : i32, i32
  }
}

</mosaic_0001>

<bundles_post_ra>
// kernel: conv_block_3d.2
= control target key start
LH: loop header
LB: loop body
LE: loop exit
PB: predicated region body
PF: predicated region fallthrough
CT: control target
= control target key end

     0   :  { %s1271_s9 = smov 0   ;;  %s1436_s0 = inlined_call_operand.vmem [shape: bf16[1024,128], index: 0, kind: input, shape index: {}]   ;;  %s1437_s1 = inlined_call_operand.vmem [shape: bf16[128,128], index: 1, kind: input, shape index: {}]   ;;  %s1438_s2 = inlined_call_operand.vmem [shape: f32[16,128], index: 2, kind: output, shape index: {}]  }
   0x1 LB: > { %s1277_s10 = sadd.s32 4294967295, %s1253_s9   ;;  %p1016_p0 = scmp.ge.s32.totalorder %s1253_s9, 1  ;;  %s1253_s9 = sphi %s1271_s9, %s12_s9  }
   0x2   : > { %p113_p1 = scmp.lt.s32.totalorder %s1253_s9, 3 }
   0x4   : > { %p114_p2 = pnand %p1016_p0, %p113_p1 }
   0x5   : > { %s1017_s13 = sshll.u32 (!%p114_p2), %s1277_s10, 6  ;;  %p140_p4 = scmp.lt.s32.totalorder (!%p114_p2), %s1277_s10, 1 }
   0x6   : > { %117 = sbr.rel (%p114_p2) target bundleno = 384 (0x180), region = 28  ;;  %p135_p3 = scmp.lt.s32.totalorder (!%p114_p2), %s1017_s13, 127 }
   0xb   : > { %v1207_v0 = vld [vmem:[%s1437_s1 + $0x38] sm:$0xff]   ;;  %v1208_v1 = vld [vmem:[%s1437_s1 + $0x30] sm:$0xff]   ;;  %s1440_s13 = smov (!%p135_p3, %s1017_s13), 127  ;;  %v1209_v2 = vld [vmem:[%s1437_s1 + $0x28] sm:$0xff]   ;;  %s1442_s10 = smov (!%p140_p4, %s1277_s10), 1  ;;  %v1255_v45 = vmov 0.0  }
   0xc   : > { %1102 = vmatprep.subr.bf16.mxu0 %v1207_v0  ;;  %1182 = vmatprep.subr.bf16.mxu1 %v1207_v0  ;;  %s1018_s18 = sshll.u32 %s1440_s13, 2  ;;  %v1210_v3 = vld [vmem:[%s1437_s1 + $0x20] sm:$0xff]   ;;  %v1211_v5 = vld [vmem:[%s1437_s1 + $0x18] sm:$0xff]   ;;  %v1212_v6 = vld [vmem:[%s1437_s1 + $0x10] sm:$0xff]   ;;  %s1019_s4 = sshll.u32 %s1442_s10, 3 }
   0xd   : > { %1103 = vmatpush3.bf16.msra.mxu0 %v1207_v0  ;;  %1190 = vmatpush3.bf16.msra.mxu1 %v1207_v0  ;;  %s1294_s21 = scalar_lea.vmem %s1436_s0, %s1018_s18  ;;  %v1213_v7 = vld [vmem:[%s1437_s1 + $0x8] sm:$0xff]   ;;  %v1214_v8 = vld [vmem:[%s1437_s1] sm:$0xff]   ;;  %s1352_s7 = scalar_lea.vmem %s1438_s2, %s1019_s4 }
   0xe   : > { %1104 = vmatprep.subr.bf16.mxu0 %v1208_v1  ;;  %1183 = vmatprep.subr.bf16.mxu1 %v1208_v1  ;;  %v1215_v4 = vld [vmem:[%s1294_s21] sm:$0xff]   ;;  %v1216_v10 = vld [vmem:[%s1294_s21 + $0x8] sm:$0xff]   ;;  %v1217_v11 = vld [vmem:[%s1294_s21 + $0x10] sm:$0xff]   ;;  %754 = vst [vmem:[%s1352_s7] sm:$0xff] %v1255_v45 }
   0xf   : > { %1118 = vmatprep.mubr.bf16.mxu0 %v1215_v4  ;;  %v1231_v9 = vld [vmem:[%s1294_s21 + $0x80] sm:$0xff]   ;;  %v1232_v12 = vld [vmem:[%s1294_s21 + $0x88] sm:$0xff]   ;;  %v1233_v13 = vld [vmem:[%s1294_s21 + $0x90] sm:$0xff]  }
  0x10   : > { %1150 = vmatprep.mubr.bf16.mxu1 %v1231_v9  ;;  %v1218_v14 = vld [vmem:[%s1294_s21 + $0x18] sm:$0xff]   ;;  %v1219_v15 = vld [vmem:[%s1294_s21 + $0x20] sm:$0xff]   ;;  %v1220_v18 = vld [vmem:[%s1294_s21 + $0x28] sm:$0xff]  }
  0x11   : > { %1105 = vmatpush3.bf16.msra.mxu0 %v1208_v1  ;;  %1191 = vmatpush3.bf16.msra.mxu1 %v1208_v1  ;;  %v1234_v16 = vld [vmem:[%s1294_s21 + $0x98] sm:$0xff]   ;;  %v1235_v17 = vld [vmem:[%s1294_s21 + $0xa0] sm:$0xff]   ;;  %v1236_v19 = vld [vmem:[%s1294_s21 + $0xa8] sm:$0xff]  }
  0x12   : > { %1106 = vmatprep.subr.bf16.mxu0 %v1209_v2  ;;  %1184 = vmatprep.subr.bf16.mxu1 %v1209_v2  ;;  %v1221_v20 = vld [vmem:[%s1294_s21 + $0x30] sm:$0xff]   ;;  %v1222_v22 = vld [vmem:[%s1294_s21 + $0x38] sm:$0xff]   ;;  %v1223_v24 = vld [vmem:[%s1294_s21 + $0x40] sm:$0xff]  }
  0x13   : > { %v1237_v21 = vld [vmem:[%s1294_s21 + $0xb0] sm:$0xff]   ;;  %v1238_v23 = vld [vmem:[%s1294_s21 + $0xb8] sm:$0xff]   ;;  %v1239_v25 = vld [vmem:[%s1294_s21 + $0xc0] sm:$0xff]  }
  0x14   : > { %v1224_v26 = vld [vmem:[%s1294_s21 + $0x48] sm:$0xff]   ;;  %v1225_v28 = vld [vmem:[%s1294_s21 + $0x50] sm:$0xff]   ;;  %v1226_v30 = vld [vmem:[%s1294_s21 + $0x58] sm:$0xff]  }
  0x15   : > { %1107 = vmatpush3.bf16.msra.mxu0 %v1209_v2  ;;  %1192 = vmatpush3.bf16.msra.mxu1 %v1209_v2  ;;  %v1240_v27 = vld [vmem:[%s1294_s21 + $0xc8] sm:$0xff]   ;;  %v1241_v29 = vld [vmem:[%s1294_s21 + $0xd0] sm:$0xff]   ;;  %v1242_v31 = vld [vmem:[%s1294_s21 + $0xd8] sm:$0xff]  }
  0x16   : > { %1108 = vmatprep.subr.bf16.mxu0 %v1210_v3  ;;  %1185 = vmatprep.subr.bf16.mxu1 %v1210_v3  ;;  %v1227_v32 = vld [vmem:[%s1294_s21 + $0x60] sm:$0xff]   ;;  %v1228_v34 = vld [vmem:[%s1294_s21 + $0x68] sm:$0xff]   ;;  %v1229_v36 = vld [vmem:[%s1294_s21 + $0x70] sm:$0xff]  }
  0x17   : > { %v1243_v33 = vld [vmem:[%s1294_s21 + $0xe0] sm:$0xff]   ;;  %v1244_v35 = vld [vmem:[%s1294_s21 + $0xe8] sm:$0xff]   ;;  %v1245_v37 = vld [vmem:[%s1294_s21 + $0xf0] sm:$0xff]  }
  0x18   : > { %v1230_v38 = vld [vmem:[%s1294_s21 + $0x78] sm:$0xff]  }
  0x19   : > { %1109 = vmatpush3.bf16.msra.mxu0 %v1210_v3  ;;  %1193 = vmatpush3.bf16.msra.mxu1 %v1210_v3  ;;  %v1246_v39 = vld [vmem:[%s1294_s21 + $0xf8] sm:$0xff]  }
  0x1a   : > { %1110 = vmatprep.subr.bf16.mxu0 %v1211_v5  ;;  %1186 = vmatprep.subr.bf16.mxu1 %v1211_v5 }
  0x1d   : > { %1111 = vmatpush3.bf16.msra.mxu0 %v1211_v5  ;;  %1194 = vmatpush3.bf16.msra.mxu1 %v1211_v5 }
  0x1e   : > { %1112 = vmatprep.subr.bf16.mxu0 %v1212_v6  ;;  %1187 = vmatprep.subr.bf16.mxu1 %v1212_v6 }
  0x21   : > { %1113 = vmatpush3.bf16.msra.mxu0 %v1212_v6  ;;  %1195 = vmatpush3.bf16.msra.mxu1 %v1212_v6 }
  0x22   : > { %1114 = vmatprep.subr.bf16.mxu0 %v1213_v7  ;;  %1188 = vmatprep.subr.bf16.mxu1 %v1213_v7 }
  0x25   : > { %1115 = vmatpush3.bf16.msra.mxu0 %v1213_v7  ;;  %1196 = vmatpush3.bf16.msra.mxu1 %v1213_v7 }
  0x26   : > { %1116 = vmatprep.subr.bf16.mxu0 %v1214_v8  ;;  %1189 = vmatprep.subr.bf16.mxu1 %v1214_v8 }
  0x29   : > { %1117 = vmatpush3.bf16.msra.mxu0 %v1214_v8  ;;  %1197 = vmatpush3.bf16.msra.mxu1 %v1214_v8 }
  0x2c   : > { %1119 = vmatmul.mubr.bf16.vlgmr.msra.gmra.mxu0 %v1216_v10  ;;  %1151 = vmatmul.mubr.bf16.vlgmr.msra.gmra.mxu1 %v1232_v12 }
  0x2d   : > { %1122 = vmatprep.mubr.bf16.mxu0 %v1217_v11  ;;  %1154 = vmatprep.mubr.bf16.mxu1 %v1233_v13 }
  0x34   : > { %1123 = vmatmul.mubr.bf16.gmra.mxu0 %v1218_v14  ;;  %1155 = vmatmul.mubr.bf16.gmra.mxu1 %v1234_v16 }
  0x35   : > { %1126 = vmatprep.mubr.bf16.mxu0 %v1219_v15  ;;  %1158 = vmatprep.mubr.bf16.mxu1 %v1235_v17 }
  0x3c   : > { %1127 = vmatmul.mubr.bf16.gmra.mxu0 %v1220_v18  ;;  %1159 = vmatmul.mubr.bf16.gmra.mxu1 %v1236_v19 }
  0x3d   : > { %1130 = vmatprep.mubr.bf16.mxu0 %v1221_v20  ;;  %1162 = vmatprep.mubr.bf16.mxu1 %v1237_v21 }
  0x44   : > { %1131 = vmatmul.mubr.bf16.gmra.mxu0 %v1222_v22  ;;  %1163 = vmatmul.mubr.bf16.gmra.mxu1 %v1238_v23 }
  0x45   : > { %1134 = vmatprep.mubr.bf16.mxu0 %v1223_v24  ;;  %1166 = vmatprep.mubr.bf16.mxu1 %v1239_v25 }
  0x4c   : > { %1135 = vmatmul.mubr.bf16.gmra.mxu0 %v1224_v26  ;;  %1167 = vmatmul.mubr.bf16.gmra.mxu1 %v1240_v27 }
  0x4d   : > { %1138 = vmatprep.mubr.bf16.mxu0 %v1225_v28  ;;  %1170 = vmatprep.mubr.bf16.mxu1 %v1241_v29 }
  0x54   : > { %1139 = vmatmul.mubr.bf16.gmra.mxu0 %v1226_v30  ;;  %1171 = vmatmul.mubr.bf16.gmra.mxu1 %v1242_v31 }
  0x55   : > { %1142 = vmatprep.mubr.bf16.mxu0 %v1227_v32  ;;  %1174 = vmatprep.mubr.bf16.mxu1 %v1243_v33 }
  0x5c   : > { %1143 = vmatmul.mubr.bf16.gmra.mxu0 %v1228_v34  ;;  %1175 = vmatmul.mubr.bf16.gmra.mxu1 %v1244_v35 }
  0x5d   : > { %1146 = vmatprep.mubr.bf16.mxu0 %v1229_v36  ;;  %1178 = vmatprep.mubr.bf16.mxu1 %v1245_v37 }
  0x64   : > { %1147 = vmatmul.mubr.bf16.gmra.mxu0 %v1230_v38  ;;  %1179 = vmatmul.mubr.bf16.gmra.mxu1 %v1246_v39 }
  0xec   : > { %v1120_v40 = vpop.f32.mrf.mxu0  ;;  %v1344_v41 = vpop.f32.mrf.mxu1 }
  0xed   : > { %v827_v52 = vmul.f32 %v1120_v40, %v1120_v40 }
  0xee   : > { %v499_v42 = vpop.f32.mrf.mxu0  ;;  %v1347_v44 = vpop.f32.mrf.mxu1 }
  0xef   : > { %v825_v47 = vmul.f32 %v499_v42, %v499_v42 }
  0xf0   : > { %v1121_v43 = vpop.f32.mrf.mxu0  ;;  %v1355_v51 = vpop.f32.mrf.mxu1 }
  0xf1   : > { %v828_v56 = vmul.f32 %v1121_v43, %v1121_v43 }
  0xf2   : > { %v502_v46 = vpop.f32.mrf.mxu0  ;;  %v1357_v60 = vpop.f32.mrf.mxu1 }
  0xf3   : > { %v755_v48 = vadd.f32 %v502_v46, %v499_v42  ;;  %v826_v49 = vmul.f32 %v502_v46, %v502_v46 }
  0xf4   : > { %v1124_v50 = vpop.f32.mrf.mxu0  ;;  %v1359_v5 = vpop.f32.mrf.mxu1 }
  0xf5   : > { %v756_v53 = vadd.f32 %v1120_v40, %v755_v48  ;;  %v889_v54 = vadd.f32 %v826_v49, %v825_v47  ;;  %v831_v6 = vmul.f32 %v1124_v50, %v1124_v50 }
  0xf6   : > { %v515_v55 = vpop.f32.mrf.mxu0  ;;  %v1361_v14 = vpop.f32.mrf.mxu1 }
  0xf7   : > { %v890_v57 = vadd.f32 %v889_v54, %v827_v52  ;;  %v757_v58 = vadd.f32 %v1121_v43, %v756_v53  ;;  %v829_v62 = vmul.f32 %v515_v55, %v515_v55 }
  0xf8   : > { %v1125_v59 = vpop.f32.mrf.mxu0  ;;  %v1363_v23 = vpop.f32.mrf.mxu1 }
  0xf9   : > { %v758_v61 = vadd.f32 %v757_v58, %v515_v55  ;;  %v891_v63 = vadd.f32 %v890_v57, %v828_v56  ;;  %v832_v10 = vmul.f32 %v1125_v59, %v1125_v59 }
  0xfa   : > { %v518_v0 = vpop.f32.mrf.mxu0  ;;  %v1365_v32 = vpop.f32.mrf.mxu1 }
  0xfb   : > { %v892_v1 = vadd.f32 %v891_v63, %v829_v62  ;;  %v759_v2 = vadd.f32 %v758_v61, %v518_v0  ;;  %v830_v3 = vmul.f32 %v518_v0, %v518_v0 }
  0xfc   : > { %v1128_v4 = vpop.f32.mrf.mxu0  ;;  %v1367_v42 = vpop.f32.mrf.mxu1 }
  0xfd   : > { %v760_v7 = vadd.f32 %v1124_v50, %v759_v2  ;;  %v893_v8 = vadd.f32 %v892_v1, %v830_v3  ;;  %v835_v24 = vmul.f32 %v1128_v4, %v1128_v4 }
  0xfe   : > { %v531_v9 = vpop.f32.mrf.mxu0  ;;  %v1369_v53 = vpop.f32.mrf.mxu1 }
  0xff   : > { %v894_v11 = vadd.f32 %v893_v8, %v831_v6  ;;  %v761_v12 = vadd.f32 %v1125_v59, %v760_v7  ;;  %v833_v16 = vmul.f32 %v531_v9, %v531_v9 }
 0x100   : > { %v1129_v13 = vpop.f32.mrf.mxu0  ;;  %v1371_v63 = vpop.f32.mrf.mxu1 }
 0x101   : > { %v762_v15 = vadd.f32 %v761_v12, %v531_v9  ;;  %v895_v17 = vadd.f32 %v894_v11, %v832_v10  ;;  %v836_v28 = vmul.f32 %v1129_v13, %v1129_v13 }
 0x102   : > { %v534_v18 = vpop.f32.mrf.mxu0  ;;  %v1373_v9 = vpop.f32.mrf.mxu1 }
 0x103   : > { %v896_v19 = vadd.f32 %v895_v17, %v833_v16  ;;  %v763_v20 = vadd.f32 %v762_v15, %v534_v18  ;;  %v834_v21 = vmul.f32 %v534_v18, %v534_v18 }
 0x104   : > { %v1132_v22 = vpop.f32.mrf.mxu0 }
 0x105   : > { %v764_v25 = vadd.f32 %v1128_v4, %v763_v20  ;;  %v897_v26 = vadd.f32 %v896_v19, %v834_v21  ;;  %v839_v43 = vmul.f32 %v1132_v22, %v1132_v22  ;;  %v1375_v19 = vpop.f32.mrf.mxu1 }
 0x106   : > { %v547_v27 = vpop.f32.mrf.mxu0 }
 0x107   : > { %v898_v29 = vadd.f32 %v897_v26, %v835_v24  ;;  %v765_v30 = vadd.f32 %v1129_v13, %v764_v25  ;;  %v837_v34 = vmul.f32 %v547_v27, %v547_v27 }
 0x108   : > { %v1133_v31 = vpop.f32.mrf.mxu0 }
 0x109   : > { %v766_v33 = vadd.f32 %v765_v30, %v547_v27  ;;  %v899_v35 = vadd.f32 %v898_v29, %v836_v28  ;;  %v840_v48 = vmul.f32 %v1133_v31, %v1133_v31  ;;  %v1377_v29 = vpop.f32.mrf.mxu1 }
 0x10a   : > { %v550_v36 = vpop.f32.mrf.mxu0 }
 0x10b   : > { %v900_v37 = vadd.f32 %v899_v35, %v837_v34  ;;  %v767_v38 = vadd.f32 %v766_v33, %v550_v36  ;;  %v838_v39 = vmul.f32 %v550_v36, %v550_v36 }
 0x10c   : > { %v1136_v40 = vpop.f32.mrf.mxu0 }
 0x10d   : > { %v768_v45 = vadd.f32 %v1132_v22, %v767_v38  ;;  %v901_v46 = vadd.f32 %v900_v37, %v838_v39  ;;  %v843_v0 = vmul.f32 %v1136_v40, %v1136_v40  ;;  %v1379_v39 = vpop.f32.mrf.mxu1 }
 0x10e   : > { %v563_v47 = vpop.f32.mrf.mxu0 }
 0x10f   : > { %v902_v49 = vadd.f32 %v901_v46, %v839_v43  ;;  %v769_v50 = vadd.f32 %v1133_v31, %v768_v45  ;;  %v841_v55 = vmul.f32 %v563_v47, %v563_v47 }
 0x110   : > { %v1137_v52 = vpop.f32.mrf.mxu0 }
 0x111   : > { %v770_v54 = vadd.f32 %v769_v50, %v563_v47  ;;  %v903_v56 = vadd.f32 %v902_v49, %v840_v48  ;;  %v844_v4 = vmul.f32 %v1137_v52, %v1137_v52 }
 0x112   : > { %v566_v57 = vpop.f32.mrf.mxu0 }
 0x113   : > { %v904_v58 = vadd.f32 %v903_v56, %v841_v55  ;;  %v771_v59 = vadd.f32 %v770_v54, %v566_v57  ;;  %v842_v61 = vmul.f32 %v566_v57, %v566_v57 }
 0x114   : > { %v1140_v62 = vpop.f32.mrf.mxu0 }
 0x115   : > { %v772_v1 = vadd.f32 %v1136_v40, %v771_v59  ;;  %v905_v2 = vadd.f32 %v904_v58, %v842_v61  ;;  %v847_v20 = vmul.f32 %v1140_v62, %v1140_v62 }
 0x116   : > { %v579_v3 = vpop.f32.mrf.mxu0 }
 0x117   : > { %v906_v6 = vadd.f32 %v905_v2, %v843_v0  ;;  %v773_v7 = vadd.f32 %v1137_v52, %v772_v1  ;;  %v845_v11 = vmul.f32 %v579_v3, %v579_v3  ;;  %v678_v52 = vpop.f32.mrf.mxu1 }
 0x118   : > { %v1141_v8 = vpop.f32.mrf.mxu0 }
 0x119   : > { %v774_v10 = vadd.f32 %v773_v7, %v579_v3  ;;  %v907_v12 = vadd.f32 %v906_v6, %v844_v4  ;;  %v848_v25 = vmul.f32 %v1141_v8, %v1141_v8 }
 0x11a   : > { %v582_v13 = vpop.f32.mrf.mxu0 }
 0x11b   : > { %v908_v15 = vadd.f32 %v907_v12, %v845_v11  ;;  %v775_v16 = vadd.f32 %v774_v10, %v582_v13  ;;  %v846_v17 = vmul.f32 %v582_v13, %v582_v13  ;;  %v858_v13 = vmul.f32 %v1357_v60, %v1357_v60 }
 0x11c   : > { %v1144_v18 = vpop.f32.mrf.mxu0 }
 0x11d   : > { %v776_v21 = vadd.f32 %v1140_v62, %v775_v16  ;;  %v909_v22 = vadd.f32 %v908_v15, %v846_v17  ;;  %v851_v40 = vmul.f32 %v1144_v18, %v1144_v18  ;;  %v1381_v62 = vpop.f32.mrf.mxu1  ;;  %v859_v17 = vmul.f32 %v1344_v41, %v1344_v41 }
 0x11e   : > { %v595_v24 = vpop.f32.mrf.mxu0 }
 0x11f   : > { %v910_v26 = vadd.f32 %v909_v22, %v847_v20  ;;  %v777_v27 = vadd.f32 %v1141_v8, %v776_v21  ;;  %v849_v31 = vmul.f32 %v595_v24, %v595_v24  ;;  %v691_v7 = vpop.f32.mrf.mxu1  ;;  %v857_v8 = vmul.f32 %v1347_v44, %v1347_v44 }
 0x120   : > { %v1145_v28 = vpop.f32.mrf.mxu0  ;;  %v860_v21 = vmul.f32 %v1355_v51, %v1355_v51 }
 0x121   : > { %v778_v30 = vadd.f32 %v777_v27, %v595_v24  ;;  %v911_v33 = vadd.f32 %v910_v26, %v848_v25  ;;  %v852_v47 = vmul.f32 %v1145_v28, %v1145_v28  ;;  %v1169_v16 = vpop.f32.mrf.mxu1 }
 0x122   : > { %v598_v34 = vpop.f32.mrf.mxu0 }
 0x123   : > { %v912_v35 = vadd.f32 %v911_v33, %v849_v31  ;;  %v779_v36 = vadd.f32 %v778_v30, %v598_v34  ;;  %v850_v37 = vmul.f32 %v598_v34, %v598_v34  ;;  %v863_v31 = vmul.f32 %v1359_v5, %v1359_v5 }
 0x124   : > { %v1148_v38 = vpop.f32.mrf.mxu0  ;;  %v864_v34 = vmul.f32 %v1363_v23, %v1363_v23 }
 0x125   : > { %v780_v43 = vadd.f32 %v1144_v18, %v779_v36  ;;  %v913_v45 = vadd.f32 %v912_v35, %v850_v37  ;;  %v855_v0 = vmul.f32 %v1148_v38, %v1148_v38 }
 0x126   : > { %v611_v46 = vpop.f32.mrf.mxu0 }
 0x127   : > { %v914_v48 = vadd.f32 %v913_v45, %v851_v40  ;;  %v781_v49 = vadd.f32 %v1145_v28, %v780_v43  ;;  %v853_v55 = vmul.f32 %v611_v46, %v611_v46 }
 0x128   : > { %v1149_v50 = vpop.f32.mrf.mxu0 }
 0x129   : > { %v782_v54 = vadd.f32 %v781_v49, %v611_v46  ;;  %v915_v56 = vadd.f32 %v914_v48, %v852_v47  ;;  %v856_v3 = vmul.f32 %v1149_v50, %v1149_v50  ;;  %v867_v46 = vmul.f32 %v1367_v42, %v1367_v42 }
 0x12a   : > { %v614_v57 = vpop.f32.mrf.mxu0  ;;  %v868_v48 = vmul.f32 %v1371_v63, %v1371_v63 }
 0x12b   : > { %v916_v58 = vadd.f32 %v915_v56, %v853_v55  ;;  %v783_v59 = vadd.f32 %v782_v54, %v614_v57  ;;  %v854_v61 = vmul.f32 %v614_v57, %v614_v57  ;;  %v869_v55 = vmul.f32 %v1377_v29, %v1377_v29 }
 0x12d   : > { %v784_v1 = vadd.f32 %v1148_v38, %v783_v59  ;;  %v917_v2 = vadd.f32 %v916_v58, %v854_v61  ;;  %v865_v38 = vmul.f32 %v1369_v53, %v1369_v53  ;;  %v870_v58 = vmul.f32 %v678_v52, %v678_v52 }
 0x12f   : > { %v785_v4 = vadd.f32 %v1149_v50, %v784_v1  ;;  %v918_v6 = vadd.f32 %v917_v2, %v855_v0 }
 0x131   : > { %v919_v10 = vadd.f32 %v918_v6, %v856_v3  ;;  %v786_v11 = vadd.f32 %v785_v4, %v1347_v44  ;;  %v694_v44 = vpop.f32.mrf.mxu1 }
 0x133   : > { %v787_v12 = vadd.f32 %v786_v11, %v1357_v60  ;;  %v920_v15 = vadd.f32 %v919_v10, %v857_v8  ;;  %v861_v60 = vmul.f32 %v1361_v14, %v1361_v14  ;;  %v1172_v30 = vpop.f32.mrf.mxu1 }
 0x135   : > { %v788_v18 = vadd.f32 %v1344_v41, %v787_v12  ;;  %v921_v20 = vadd.f32 %v920_v15, %v858_v13  ;;  %v862_v41 = vmul.f32 %v1365_v32, %v1365_v32  ;;  %v707_v36 = vpop.f32.mrf.mxu1  ;;  %v875_v12 = vmul.f32 %v1381_v62, %v1381_v62 }
 0x136   : > { %v876_v15 = vmul.f32 %v1169_v16, %v1169_v16 }
 0x137   : > { %v922_v22 = vadd.f32 %v921_v20, %v859_v17  ;;  %v789_v24 = vadd.f32 %v1355_v51, %v788_v18  ;;  %v1173_v45 = vpop.f32.mrf.mxu1 }
 0x139   : > { %v790_v25 = vadd.f32 %v789_v24, %v1361_v14  ;;  %v923_v26 = vadd.f32 %v922_v22, %v860_v21  ;;  %v710_v50 = vpop.f32.mrf.mxu1 }
 0x13b   : > { %v924_v27 = vadd.f32 %v923_v26, %v861_v60  ;;  %v791_v28 = vadd.f32 %v790_v25, %v1365_v32  ;;  %v1176_v59 = vpop.f32.mrf.mxu1  ;;  %v878_v25 = vmul.f32 %v710_v50, %v710_v50  ;;  %v879_v26 = vmul.f32 %v1172_v30, %v1172_v30 }
 0x13d   : > { %v792_v33 = vadd.f32 %v1359_v5, %v791_v28  ;;  %v925_v51 = vadd.f32 %v924_v27, %v862_v41  ;;  %v866_v5 = vmul.f32 %v1373_v9, %v1373_v9  ;;  %v723_v3 = vpop.f32.mrf.mxu1  ;;  %v880_v28 = vmul.f32 %v1173_v45, %v1173_v45 }
 0x13f   : > { %v926_v35 = vadd.f32 %v925_v51, %v863_v31  ;;  %v793_v14 = vadd.f32 %v1363_v23, %v792_v33  ;;  %v1177_v11 = vpop.f32.mrf.mxu1  ;;  %v881_v51 = vmul.f32 %v723_v3, %v723_v3 }
 0x141   : > { %v794_v37 = vadd.f32 %v793_v14, %v1369_v53  ;;  %v927_v32 = vadd.f32 %v926_v35, %v864_v34  ;;  %v726_v20 = vpop.f32.mrf.mxu1 }
 0x142   : > { %v882_v14 = vmul.f32 %v726_v20, %v726_v20 }
 0x143   : > { %v928_v40 = vadd.f32 %v927_v32, %v865_v38  ;;  %v795_v43 = vadd.f32 %v794_v37, %v1373_v9  ;;  %v1180_v60 = vpop.f32.mrf.mxu1 }
 0x145   : > { %v796_v47 = vadd.f32 %v1367_v42, %v795_v43  ;;  %v929_v23 = vadd.f32 %v928_v40, %v866_v5  ;;  %v871_v42 = vmul.f32 %v1375_v19, %v1375_v19  ;;  %v739_v33 = vpop.f32.mrf.mxu1  ;;  %v884_v40 = vmul.f32 %v1177_v11, %v1177_v11 }
 0x147   : > { %v930_v49 = vadd.f32 %v929_v23, %v867_v46  ;;  %v797_v53 = vadd.f32 %v1371_v63, %v796_v47  ;;  %v872_v63 = vmul.f32 %v1379_v39, %v1379_v39  ;;  %v1181_v37 = vpop.f32.mrf.mxu1  ;;  %v885_v47 = vmul.f32 %v739_v33, %v739_v33 }
 0x149   : > { %v798_v54 = vadd.f32 %v797_v53, %v1377_v29  ;;  %v931_v9 = vadd.f32 %v930_v49, %v868_v48  ;;  %v873_v29 = vmul.f32 %v691_v7, %v691_v7  ;;  %v742_v46 = vpop.f32.mrf.mxu1  ;;  %v887_v53 = vmul.f32 %v1180_v60, %v1180_v60 }
 0x14a   : > { %v886_v49 = vmul.f32 %v742_v46, %v742_v46 }
 0x14b   : > { %v932_v56 = vadd.f32 %v931_v9, %v869_v55  ;;  %v799_v57 = vadd.f32 %v798_v54, %v678_v52  ;;  %v874_v52 = vmul.f32 %v694_v44, %v694_v44  ;;  %v888_v55 = vmul.f32 %v1181_v37, %v1181_v37 }
 0x14d   : > { %v800_v61 = vadd.f32 %v1375_v19, %v799_v57  ;;  %v933_v0 = vadd.f32 %v932_v56, %v870_v58 }
 0x14f   : > { %v934_v1 = vadd.f32 %v933_v0, %v871_v42  ;;  %v801_v2 = vadd.f32 %v1379_v39, %v800_v61  ;;  %v877_v39 = vmul.f32 %v707_v36, %v707_v36 }
 0x151   : > { %v802_v4 = vadd.f32 %v801_v2, %v691_v7  ;;  %v935_v6 = vadd.f32 %v934_v1, %v872_v63 }
 0x153   : > { %v936_v8 = vadd.f32 %v935_v6, %v873_v29  ;;  %v803_v10 = vadd.f32 %v802_v4, %v694_v44 }
 0x155   : > { %v804_v19 = vadd.f32 %v1381_v62, %v803_v10  ;;  %v937_v13 = vadd.f32 %v936_v8, %v874_v52 }
 0x157   : > { %v938_v17 = vadd.f32 %v937_v13, %v875_v12  ;;  %v805_v18 = vadd.f32 %v1169_v16, %v804_v19 }
 0x159   : > { %v806_v21 = vadd.f32 %v805_v18, %v707_v36  ;;  %v939_v22 = vadd.f32 %v938_v17, %v876_v15  ;;  %v883_v36 = vmul.f32 %v1176_v59, %v1176_v59 }
 0x15b   : > { %v940_v24 = vadd.f32 %v939_v22, %v877_v39  ;;  %v807_v7 = vadd.f32 %v806_v21, %v710_v50 }
 0x15d   : > { %v808_v44 = vadd.f32 %v1172_v30, %v807_v7  ;;  %v941_v27 = vadd.f32 %v940_v24, %v878_v25 }
 0x15f   : > { %v942_v41 = vadd.f32 %v941_v27, %v879_v26  ;;  %v809_v31 = vadd.f32 %v1173_v45, %v808_v44 }
 0x161   : > { %v810_v62 = vadd.f32 %v809_v31, %v723_v3  ;;  %v943_v34 = vadd.f32 %v942_v41, %v880_v28 }
 0x163   : > { %v944_v35 = vadd.f32 %v943_v34, %v881_v51  ;;  %v811_v16 = vadd.f32 %v810_v62, %v726_v20 }
 0x165   : > { %v812_v38 = vadd.f32 %v1176_v59, %v811_v16  ;;  %v945_v32 = vadd.f32 %v944_v35, %v882_v14 }
 0x167   : > { %v946_v43 = vadd.f32 %v945_v32, %v883_v36  ;;  %v813_v5 = vadd.f32 %v1177_v11, %v812_v38 }
 0x169   : > { %v814_v30 = vadd.f32 %v813_v5, %v739_v33  ;;  %v947_v23 = vadd.f32 %v946_v43, %v884_v40 }
 0x16b   : > { %v948_v48 = vadd.f32 %v947_v23, %v885_v47  ;;  %v815_v45 = vadd.f32 %v814_v30, %v742_v46 }
 0x16d   : > { %v816_v50 = vadd.f32 %v1180_v60, %v815_v45  ;;  %v949_v54 = vadd.f32 %v948_v48, %v886_v49 }
 0x16f   : > { %v817_v9 = vadd.f32 %v1181_v37, %v816_v50  ;;  %v950_v56 = vadd.f32 %v949_v54, %v887_v53 }
 0x171   : > { %v818_v57 = vrot.slane %v817_v9, 4  ;;  %v951_v58 = vadd.f32 %v950_v56, %v888_v55 }
 0x173   : > { %v819_v59 = vadd.f32 %v818_v57, %v817_v9  ;;  %v952_v42 = vrot.slane %v951_v58, 4 }
 0x175   : > { %v820_v61 = vrot.slane %v819_v59, 2  ;;  %v953_v0 = vadd.f32 %v952_v42, %v951_v58 }
 0x177   : > { %v821_v63 = vadd.f32 %v820_v61, %v819_v59  ;;  %v954_v1 = vrot.slane %v953_v0, 2 }
 0x179   : > { %v822_v2 = vrot.slane %v821_v63, 1  ;;  %v955_v3 = vadd.f32 %v954_v1, %v953_v0 }
 0x17b   : > { %v823_v4 = vadd.f32 %v822_v2, %v821_v63  ;;  %v956_v29 = vrot.slane %v955_v3, 1 }
 0x17d   : > { %824 = vst [vmem:[%s1352_s7] sm:$0x1] %v823_v4  ;;  %v957_v6 = vadd.f32 %v956_v29, %v955_v3 }
 0x17f   : > { %958 = vst [vmem:[%s1352_s7 + $0x1] sm:$0x1] %v957_v6 }
 0x180 PF: > { %s12_s9 = sadd.s32 1, %s1253_s9  }
 0x181   : > { %p9_p5 = scmp.ge.s32.totalorder %s12_s9, 4  }
 0x183   :  { %11 = sbr.rel (!%p9_p5) target bundleno = 1 (0x1), region = 58 }

// kernel: conv_block_3d.3
= control target key start
LH: loop header
LB: loop body
LE: loop exit
PB: predicated region body
PF: predicated region fallthrough
CT: control target
= control target key end

     0   :  { %s1471_s15 = smov 0   ;;  %s1754_s0 = inlined_call_operand.vmem [shape: bf16[1024,128], index: 0, kind: input, shape index: {}]   ;;  %s1755_s1 = inlined_call_operand.vmem [shape: bf16[128,128], index: 1, kind: input, shape index: {}]   ;;  %s1756_s2 = inlined_call_operand.vmem [shape: f32[1,128], index: 2, kind: input, shape index: {}]   ;;  %s1757_s3 = inlined_call_operand.vmem [shape: f32[1,128], index: 3, kind: input, shape index: {}]   ;;  %s1758_s4 = inlined_call_operand.vmem [shape: f32[1024,128], index: 4, kind: output, shape index: {}]  }
   0x1 LB: > { %s1201_s16 = sadd.s32 4294967295, %s1444_s15   ;;  %p1205_p0 = scmp.ge.s32.totalorder %s1444_s15, 1  ;;  %s1444_s15 = sphi %s1471_s15, %s14_s15  }
   0x2   : > { %p163_p1 = scmp.lt.s32.totalorder %s1444_s15, 3 }
   0x4   : > { %p164_p2 = pnand %p1205_p0, %p163_p1 }
   0x5   : > { %s1206_s19 = sshll.u32 (!%p164_p2), %s1201_s16, 6 }
   0x6   : > { %167 = sbr.rel (%p164_p2) target bundleno = 310 (0x136), region = 36  ;;  %p190_p3 = scmp.lt.s32.totalorder (!%p164_p2), %s1206_s19, 127 }
   0xb   : > { %v1398_v0 = vld [vmem:[%s1755_s1 + $0x38] sm:$0xff]   ;;  %v1399_v1 = vld [vmem:[%s1755_s1 + $0x30] sm:$0xff]   ;;  %s1760_s19 = smov (!%p190_p3, %s1206_s19), 127  ;;  %v1400_v2 = vld [vmem:[%s1755_s1 + $0x28] sm:$0xff]  }
   0xc   : > { %1294 = vmatprep.subr.bf16.mxu0 %v1398_v0  ;;  %1374 = vmatprep.subr.bf16.mxu1 %v1398_v0  ;;  %s1207_s24 = sshll.u32 %s1760_s19, 2  ;;  %v1401_v3 = vld [vmem:[%s1755_s1 + $0x20] sm:$0xff]   ;;  %v1402_v6 = vld [vmem:[%s1755_s1 + $0x18] sm:$0xff]   ;;  %v1403_v7 = vld [vmem:[%s1755_s1 + $0x10] sm:$0xff]   ;;  %s1209_s17 = sshll.u32 %s1760_s19, 3 }
   0xd   : > { %1295 = vmatpush3.bf16.msra.mxu0 %v1398_v0  ;;  %1382 = vmatpush3.bf16.msra.mxu1 %v1398_v0  ;;  %s1494_s27 = scalar_lea.vmem %s1754_s0, %s1207_s24  ;;  %v1404_v8 = vld [vmem:[%s1755_s1 + $0x8] sm:$0xff]   ;;  %v1405_v9 = vld [vmem:[%s1755_s1] sm:$0xff]   ;;  %s1565_s19 = scalar_lea.vmem %s1758_s4, %s1209_s17 }
   0xe   : > { %1296 = vmatprep.subr.bf16.mxu0 %v1399_v1  ;;  %1375 = vmatprep.subr.bf16.mxu1 %v1399_v1  ;;  %v1406_v4 = vld [vmem:[%s1494_s27] sm:$0xff]   ;;  %v1408_v10 = vld [vmem:[%s1494_s27 + $0x8] sm:$0xff]   ;;  %v1410_v12 = vld [vmem:[%s1494_s27 + $0x10] sm:$0xff]  }
   0xf   : > { %v1407_v5 = vld [vmem:[%s1494_s27 + $0x80] sm:$0xff]   ;;  %1310 = vmatprep.mubr.bf16.mxu0 %v1406_v4  ;;  %v1409_v11 = vld [vmem:[%s1494_s27 + $0x88] sm:$0xff]   ;;  %v1411_v13 = vld [vmem:[%s1494_s27 + $0x90] sm:$0xff]  }
  0x10   : > { %1342 = vmatprep.mubr.bf16.mxu1 %v1407_v5  ;;  %v1412_v14 = vld [vmem:[%s1494_s27 + $0x18] sm:$0xff]   ;;  %v1414_v16 = vld [vmem:[%s1494_s27 + $0x20] sm:$0xff]   ;;  %v1416_v18 = vld [vmem:[%s1494_s27 + $0x28] sm:$0xff]  }
  0x11   : > { %1297 = vmatpush3.bf16.msra.mxu0 %v1399_v1  ;;  %1383 = vmatpush3.bf16.msra.mxu1 %v1399_v1  ;;  %v1413_v15 = vld [vmem:[%s1494_s27 + $0x98] sm:$0xff]   ;;  %v1415_v17 = vld [vmem:[%s1494_s27 + $0xa0] sm:$0xff]   ;;  %v1417_v19 = vld [vmem:[%s1494_s27 + $0xa8] sm:$0xff]  }
  0x12   : > { %1298 = vmatprep.subr.bf16.mxu0 %v1400_v2  ;;  %1376 = vmatprep.subr.bf16.mxu1 %v1400_v2  ;;  %v1418_v20 = vld [vmem:[%s1494_s27 + $0x30] sm:$0xff]   ;;  %v1420_v22 = vld [vmem:[%s1494_s27 + $0x38] sm:$0xff]   ;;  %v1422_v24 = vld [vmem:[%s1494_s27 + $0x40] sm:$0xff]  }
  0x13   : > { %v1419_v21 = vld [vmem:[%s1494_s27 + $0xb0] sm:$0xff]   ;;  %v1421_v23 = vld [vmem:[%s1494_s27 + $0xb8] sm:$0xff]   ;;  %v1423_v25 = vld [vmem:[%s1494_s27 + $0xc0] sm:$0xff]  }
  0x14   : > { %v1424_v26 = vld [vmem:[%s1494_s27 + $0x48] sm:$0xff]   ;;  %v1426_v28 = vld [vmem:[%s1494_s27 + $0x50] sm:$0xff]   ;;  %v1428_v30 = vld [vmem:[%s1494_s27 + $0x58] sm:$0xff]  }
  0x15   : > { %1299 = vmatpush3.bf16.msra.mxu0 %v1400_v2  ;;  %1384 = vmatpush3.bf16.msra.mxu1 %v1400_v2  ;;  %v1425_v27 = vld [vmem:[%s1494_s27 + $0xc8] sm:$0xff]   ;;  %v1427_v29 = vld [vmem:[%s1494_s27 + $0xd0] sm:$0xff]   ;;  %v1429_v31 = vld [vmem:[%s1494_s27 + $0xd8] sm:$0xff]  }
  0x16   : > { %1300 = vmatprep.subr.bf16.mxu0 %v1401_v3  ;;  %1377 = vmatprep.subr.bf16.mxu1 %v1401_v3  ;;  %v1430_v32 = vld [vmem:[%s1494_s27 + $0x60] sm:$0xff]   ;;  %v1432_v34 = vld [vmem:[%s1494_s27 + $0x68] sm:$0xff]   ;;  %v1434_v36 = vld [vmem:[%s1494_s27 + $0x70] sm:$0xff]  }
  0x17   : > { %v1431_v33 = vld [vmem:[%s1494_s27 + $0xe0] sm:$0xff]   ;;  %v1433_v35 = vld [vmem:[%s1494_s27 + $0xe8] sm:$0xff]   ;;  %v1435_v37 = vld [vmem:[%s1494_s27 + $0xf0] sm:$0xff]  }
  0x18   : > { %v1436_v38 = vld [vmem:[%s1494_s27 + $0x78] sm:$0xff]   ;;  %v1546_v40 = vld [vmem:[%s1756_s2] ss:$0 sm:$0xff] }
  0x19   : > { %1301 = vmatpush3.bf16.msra.mxu0 %v1401_v3  ;;  %1385 = vmatpush3.bf16.msra.mxu1 %v1401_v3  ;;  %v1437_v39 = vld [vmem:[%s1494_s27 + $0xf8] sm:$0xff]   ;;  %v1551_v42 = vld [vmem:[%s1757_s3] ss:$0 sm:$0xff] }
  0x1a   : > { %1302 = vmatprep.subr.bf16.mxu0 %v1402_v6  ;;  %1378 = vmatprep.subr.bf16.mxu1 %v1402_v6 }
  0x1d   : > { %1303 = vmatpush3.bf16.msra.mxu0 %v1402_v6  ;;  %1386 = vmatpush3.bf16.msra.mxu1 %v1402_v6 }
  0x1e   : > { %1304 = vmatprep.subr.bf16.mxu0 %v1403_v7  ;;  %1379 = vmatprep.subr.bf16.mxu1 %v1403_v7 }
  0x21   : > { %1305 = vmatpush3.bf16.msra.mxu0 %v1403_v7  ;;  %1387 = vmatpush3.bf16.msra.mxu1 %v1403_v7 }
  0x22   : > { %1306 = vmatprep.subr.bf16.mxu0 %v1404_v8  ;;  %1380 = vmatprep.subr.bf16.mxu1 %v1404_v8 }
  0x25   : > { %1307 = vmatpush3.bf16.msra.mxu0 %v1404_v8  ;;  %1388 = vmatpush3.bf16.msra.mxu1 %v1404_v8 }
  0x26   : > { %1308 = vmatprep.subr.bf16.mxu0 %v1405_v9  ;;  %1381 = vmatprep.subr.bf16.mxu1 %v1405_v9 }
  0x29   : > { %1309 = vmatpush3.bf16.msra.mxu0 %v1405_v9  ;;  %1389 = vmatpush3.bf16.msra.mxu1 %v1405_v9 }
  0x2c   : > { %1311 = vmatmul.mubr.bf16.vlgmr.msra.gmra.mxu0 %v1408_v10  ;;  %1343 = vmatmul.mubr.bf16.vlgmr.msra.gmra.mxu1 %v1409_v11 }
  0x2d   : > { %1314 = vmatprep.mubr.bf16.mxu0 %v1410_v12  ;;  %1346 = vmatprep.mubr.bf16.mxu1 %v1411_v13 }
  0x34   : > { %1315 = vmatmul.mubr.bf16.gmra.mxu0 %v1412_v14  ;;  %1347 = vmatmul.mubr.bf16.gmra.mxu1 %v1413_v15 }
  0x35   : > { %1318 = vmatprep.mubr.bf16.mxu0 %v1414_v16  ;;  %1350 = vmatprep.mubr.bf16.mxu1 %v1415_v17 }
  0x3c   : > { %1319 = vmatmul.mubr.bf16.gmra.mxu0 %v1416_v18  ;;  %1351 = vmatmul.mubr.bf16.gmra.mxu1 %v1417_v19 }
  0x3d   : > { %1322 = vmatprep.mubr.bf16.mxu0 %v1418_v20  ;;  %1354 = vmatprep.mubr.bf16.mxu1 %v1419_v21 }
  0x44   : > { %1323 = vmatmul.mubr.bf16.gmra.mxu0 %v1420_v22  ;;  %1355 = vmatmul.mubr.bf16.gmra.mxu1 %v1421_v23 }
  0x45   : > { %1326 = vmatprep.mubr.bf16.mxu0 %v1422_v24  ;;  %1358 = vmatprep.mubr.bf16.mxu1 %v1423_v25 }
  0x4c   : > { %1327 = vmatmul.mubr.bf16.gmra.mxu0 %v1424_v26  ;;  %1359 = vmatmul.mubr.bf16.gmra.mxu1 %v1425_v27 }
  0x4d   : > { %1330 = vmatprep.mubr.bf16.mxu0 %v1426_v28  ;;  %1362 = vmatprep.mubr.bf16.mxu1 %v1427_v29 }
  0x54   : > { %1331 = vmatmul.mubr.bf16.gmra.mxu0 %v1428_v30  ;;  %1363 = vmatmul.mubr.bf16.gmra.mxu1 %v1429_v31 }
  0x55   : > { %1334 = vmatprep.mubr.bf16.mxu0 %v1430_v32  ;;  %1366 = vmatprep.mubr.bf16.mxu1 %v1431_v33 }
  0x5c   : > { %1335 = vmatmul.mubr.bf16.gmra.mxu0 %v1432_v34  ;;  %1367 = vmatmul.mubr.bf16.gmra.mxu1 %v1433_v35 }
  0x5d   : > { %1338 = vmatprep.mubr.bf16.mxu0 %v1434_v36  ;;  %1370 = vmatprep.mubr.bf16.mxu1 %v1435_v37 }
  0x64   : > { %1339 = vmatmul.mubr.bf16.gmra.mxu0 %v1436_v38  ;;  %1371 = vmatmul.mubr.bf16.gmra.mxu1 %v1437_v39 }
  0xec   : > { %v1312_v41 = vpop.f32.mrf.mxu0  ;;  %v1344_v43 = vpop.f32.mrf.mxu1 }
  0xed   : > { %v820_v44 = vmul.f32 %v1312_v41, %v1546_v40  ;;  %v852_v45 = vmul.f32 %v1344_v43, %v1546_v40 }
  0xee   : > { %v556_v46 = vpop.f32.mrf.mxu0  ;;  %v684_v47 = vpop.f32.mrf.mxu1 }
  0xef   : > { %v891_v48 = vadd.f32 %v1551_v42, %v820_v44  ;;  %v923_v49 = vadd.f32 %v1551_v42, %v852_v45  ;;  %v818_v50 = vmul.f32 %v1546_v40, %v556_v46  ;;  %v850_v51 = vmul.f32 %v1546_v40, %v684_v47 }
  0xf0   : > { %v1313_v52 = vpop.f32.mrf.mxu0  ;;  %v1345_v53 = vpop.f32.mrf.mxu1 }
  0xf1   : > { %v955_v54 = vmax.f32 %v891_v48, 0.0  ;;  %v987_v55 = vmax.f32 %v923_v49, 0.0  ;;  %v889_v56 = vadd.f32 %v1551_v42, %v818_v50  ;;  %v921_v57 = vadd.f32 %v1551_v42, %v850_v51 }
  0xf2   : > { %v821_v58 = vmul.f32 %v1313_v52, %v1546_v40  ;;  %v853_v59 = vmul.f32 %v1345_v53, %v1546_v40  ;;  %v559_v60 = vpop.f32.mrf.mxu0  ;;  %v687_v61 = vpop.f32.mrf.mxu1 }
  0xf3   : > { %v1019_v62 = vmin.f32 %v955_v54, 6.0  ;;  %v1051_v63 = vmin.f32 %v987_v55, 6.0  ;;  %v953_v0 = vmax.f32 %v889_v56, 0.0  ;;  %v985_v1 = vmax.f32 %v921_v57, 0.0 }
  0xf4   : > { %v892_v2 = vadd.f32 %v1551_v42, %v821_v58  ;;  %v924_v3 = vadd.f32 %v1551_v42, %v853_v59  ;;  %v819_v4 = vmul.f32 %v1546_v40, %v559_v60  ;;  %v851_v5 = vmul.f32 %v1546_v40, %v687_v61  ;;  %v1316_v6 = vpop.f32.mrf.mxu0  ;;  %v1348_v7 = vpop.f32.mrf.mxu1 }
  0xf5   : > { %1083 = vst [vmem:[%s1565_s19 + $0x10] sm:$0xff] %v1019_v62  ;;  %1115 = vst [vmem:[%s1565_s19 + $0x110] sm:$0xff] %v1051_v63  ;;  %v1017_v8 = vmin.f32 %v953_v0, 6.0  ;;  %v1049_v9 = vmin.f32 %v985_v1, 6.0  ;;  %v824_v10 = vmul.f32 %v1316_v6, %v1546_v40  ;;  %v856_v11 = vmul.f32 %v1348_v7, %v1546_v40 }
  0xf6   : > { %v956_v12 = vmax.f32 %v892_v2, 0.0  ;;  %v988_v13 = vmax.f32 %v924_v3, 0.0  ;;  %v890_v14 = vadd.f32 %v1551_v42, %v819_v4  ;;  %v922_v15 = vadd.f32 %v1551_v42, %v851_v5  ;;  %v572_v16 = vpop.f32.mrf.mxu0  ;;  %v700_v17 = vpop.f32.mrf.mxu1 }
  0xf7   : > { %1081 = vst [vmem:[%s1565_s19] sm:$0xff] %v1017_v8  ;;  %1113 = vst [vmem:[%s1565_s19 + $0x100] sm:$0xff] %v1049_v9  ;;  %v895_v18 = vadd.f32 %v1551_v42, %v824_v10  ;;  %v927_v19 = vadd.f32 %v1551_v42, %v856_v11  ;;  %v822_v20 = vmul.f32 %v1546_v40, %v572_v16 }
  0xf8   : > { %v854_v21 = vmul.f32 %v1546_v40, %v700_v17  ;;  %v1020_v22 = vmin.f32 %v956_v12, 6.0  ;;  %v1052_v23 = vmin.f32 %v988_v13, 6.0  ;;  %v954_v24 = vmax.f32 %v890_v14, 0.0  ;;  %v1317_v26 = vpop.f32.mrf.mxu0  ;;  %v1349_v27 = vpop.f32.mrf.mxu1 }
  0xf9   : > { %v986_v25 = vmax.f32 %v922_v15, 0.0  ;;  %v959_v28 = vmax.f32 %v895_v18, 0.0  ;;  %v991_v29 = vmax.f32 %v927_v19, 0.0  ;;  %v893_v30 = vadd.f32 %v1551_v42, %v822_v20 }
  0xfa   : > { %v925_v31 = vadd.f32 %v1551_v42, %v854_v21  ;;  %1084 = vst [vmem:[%s1565_s19 + $0x18] sm:$0xff] %v1020_v22  ;;  %1116 = vst [vmem:[%s1565_s19 + $0x118] sm:$0xff] %v1052_v23  ;;  %v1018_v32 = vmin.f32 %v954_v24, 6.0  ;;  %v825_v34 = vmul.f32 %v1317_v26, %v1546_v40  ;;  %v857_v35 = vmul.f32 %v1349_v27, %v1546_v40  ;;  %v575_v36 = vpop.f32.mrf.mxu0  ;;  %v703_v37 = vpop.f32.mrf.mxu1 }
  0xfb   : > { %v1050_v33 = vmin.f32 %v986_v25, 6.0  ;;  %v1023_v38 = vmin.f32 %v959_v28, 6.0  ;;  %v1055_v39 = vmin.f32 %v991_v29, 6.0  ;;  %v957_v41 = vmax.f32 %v893_v30, 0.0 }
  0xfc   : > { %v989_v43 = vmax.f32 %v925_v31, 0.0  ;;  %1082 = vst [vmem:[%s1565_s19 + $0x8] sm:$0xff] %v1018_v32  ;;  %v896_v44 = vadd.f32 %v1551_v42, %v825_v34  ;;  %v928_v45 = vadd.f32 %v1551_v42, %v857_v35  ;;  %v823_v46 = vmul.f32 %v1546_v40, %v575_v36  ;;  %v1320_v48 = vpop.f32.mrf.mxu0  ;;  %v1352_v49 = vpop.f32.mrf.mxu1 }
  0xfd   : > { %1114 = vst [vmem:[%s1565_s19 + $0x108] sm:$0xff] %v1050_v33  ;;  %v855_v47 = vmul.f32 %v1546_v40, %v703_v37  ;;  %1087 = vst [vmem:[%s1565_s19 + $0x30] sm:$0xff] %v1023_v38  ;;  %v1021_v50 = vmin.f32 %v957_v41, 6.0  ;;  %v828_v52 = vmul.f32 %v1320_v48, %v1546_v40  ;;  %v860_v53 = vmul.f32 %v1352_v49, %v1546_v40 }
  0xfe   : > { %1119 = vst [vmem:[%s1565_s19 + $0x130] sm:$0xff] %v1055_v39  ;;  %v1053_v51 = vmin.f32 %v989_v43, 6.0  ;;  %v960_v54 = vmax.f32 %v896_v44, 0.0  ;;  %v992_v55 = vmax.f32 %v928_v45, 0.0  ;;  %v894_v56 = vadd.f32 %v1551_v42, %v823_v46  ;;  %v588_v58 = vpop.f32.mrf.mxu0  ;;  %v716_v59 = vpop.f32.mrf.mxu1 }
  0xff   : > { %v926_v57 = vadd.f32 %v1551_v42, %v855_v47  ;;  %1085 = vst [vmem:[%s1565_s19 + $0x20] sm:$0xff] %v1021_v50  ;;  %v899_v60 = vadd.f32 %v1551_v42, %v828_v52  ;;  %v931_v61 = vadd.f32 %v1551_v42, %v860_v53  ;;  %v826_v62 = vmul.f32 %v1546_v40, %v588_v58 }
 0x100   : > { %1117 = vst [vmem:[%s1565_s19 + $0x120] sm:$0xff] %v1053_v51  ;;  %v858_v63 = vmul.f32 %v1546_v40, %v716_v59  ;;  %v1024_v0 = vmin.f32 %v960_v54, 6.0  ;;  %v1056_v1 = vmin.f32 %v992_v55, 6.0  ;;  %v958_v2 = vmax.f32 %v894_v56, 0.0  ;;  %v1321_v4 = vpop.f32.mrf.mxu0  ;;  %v1353_v5 = vpop.f32.mrf.mxu1 }
 0x101   : > { %v990_v3 = vmax.f32 %v926_v57, 0.0  ;;  %v963_v6 = vmax.f32 %v899_v60, 0.0  ;;  %v995_v7 = vmax.f32 %v931_v61, 0.0  ;;  %v897_v8 = vadd.f32 %v1551_v42, %v826_v62 }
 0x102   : > { %v929_v9 = vadd.f32 %v1551_v42, %v858_v63  ;;  %1088 = vst [vmem:[%s1565_s19 + $0x38] sm:$0xff] %v1024_v0  ;;  %1120 = vst [vmem:[%s1565_s19 + $0x138] sm:$0xff] %v1056_v1  ;;  %v1022_v10 = vmin.f32 %v958_v2, 6.0  ;;  %v829_v12 = vmul.f32 %v1321_v4, %v1546_v40  ;;  %v861_v13 = vmul.f32 %v1353_v5, %v1546_v40  ;;  %v591_v14 = vpop.f32.mrf.mxu0  ;;  %v719_v15 = vpop.f32.mrf.mxu1 }
 0x103   : > { %v1054_v11 = vmin.f32 %v990_v3, 6.0  ;;  %v1027_v16 = vmin.f32 %v963_v6, 6.0  ;;  %v1059_v17 = vmin.f32 %v995_v7, 6.0  ;;  %v961_v18 = vmax.f32 %v897_v8, 0.0 }
 0x104   : > { %v993_v19 = vmax.f32 %v929_v9, 0.0  ;;  %1086 = vst [vmem:[%s1565_s19 + $0x28] sm:$0xff] %v1022_v10  ;;  %v900_v20 = vadd.f32 %v1551_v42, %v829_v12  ;;  %v932_v21 = vadd.f32 %v1551_v42, %v861_v13  ;;  %v827_v22 = vmul.f32 %v1546_v40, %v591_v14  ;;  %v1324_v24 = vpop.f32.mrf.mxu0  ;;  %v1356_v25 = vpop.f32.mrf.mxu1 }
 0x105   : > { %1118 = vst [vmem:[%s1565_s19 + $0x128] sm:$0xff] %v1054_v11  ;;  %v859_v23 = vmul.f32 %v1546_v40, %v719_v15  ;;  %1091 = vst [vmem:[%s1565_s19 + $0x50] sm:$0xff] %v1027_v16  ;;  %v1025_v26 = vmin.f32 %v961_v18, 6.0  ;;  %v832_v28 = vmul.f32 %v1324_v24, %v1546_v40  ;;  %v864_v29 = vmul.f32 %v1356_v25, %v1546_v40 }
 0x106   : > { %1123 = vst [vmem:[%s1565_s19 + $0x150] sm:$0xff] %v1059_v17  ;;  %v1057_v27 = vmin.f32 %v993_v19, 6.0  ;;  %v964_v30 = vmax.f32 %v900_v20, 0.0  ;;  %v996_v31 = vmax.f32 %v932_v21, 0.0  ;;  %v898_v32 = vadd.f32 %v1551_v42, %v827_v22  ;;  %v604_v34 = vpop.f32.mrf.mxu0  ;;  %v732_v35 = vpop.f32.mrf.mxu1 }
 0x107   : > { %v930_v33 = vadd.f32 %v1551_v42, %v859_v23  ;;  %1089 = vst [vmem:[%s1565_s19 + $0x40] sm:$0xff] %v1025_v26  ;;  %v903_v36 = vadd.f32 %v1551_v42, %v832_v28  ;;  %v935_v37 = vadd.f32 %v1551_v42, %v864_v29  ;;  %v830_v38 = vmul.f32 %v1546_v40, %v604_v34 }
 0x108   : > { %1121 = vst [vmem:[%s1565_s19 + $0x140] sm:$0xff] %v1057_v27  ;;  %v862_v39 = vmul.f32 %v1546_v40, %v732_v35  ;;  %v1028_v41 = vmin.f32 %v964_v30, 6.0  ;;  %v1060_v43 = vmin.f32 %v996_v31, 6.0  ;;  %v962_v44 = vmax.f32 %v898_v32, 0.0  ;;  %v1325_v46 = vpop.f32.mrf.mxu0  ;;  %v1357_v47 = vpop.f32.mrf.mxu1 }
 0x109   : > { %v994_v45 = vmax.f32 %v930_v33, 0.0  ;;  %v967_v48 = vmax.f32 %v903_v36, 0.0  ;;  %v999_v49 = vmax.f32 %v935_v37, 0.0  ;;  %v901_v50 = vadd.f32 %v1551_v42, %v830_v38 }
 0x10a   : > { %v933_v51 = vadd.f32 %v1551_v42, %v862_v39  ;;  %1092 = vst [vmem:[%s1565_s19 + $0x58] sm:$0xff] %v1028_v41  ;;  %1124 = vst [vmem:[%s1565_s19 + $0x158] sm:$0xff] %v1060_v43  ;;  %v1026_v52 = vmin.f32 %v962_v44, 6.0  ;;  %v833_v54 = vmul.f32 %v1325_v46, %v1546_v40  ;;  %v865_v55 = vmul.f32 %v1357_v47, %v1546_v40  ;;  %v607_v56 = vpop.f32.mrf.mxu0  ;;  %v735_v57 = vpop.f32.mrf.mxu1 }
 0x10b   : > { %v1058_v53 = vmin.f32 %v994_v45, 6.0  ;;  %v1031_v58 = vmin.f32 %v967_v48, 6.0  ;;  %v1063_v59 = vmin.f32 %v999_v49, 6.0  ;;  %v965_v60 = vmax.f32 %v901_v50, 0.0 }
 0x10c   : > { %v997_v61 = vmax.f32 %v933_v51, 0.0  ;;  %1090 = vst [vmem:[%s1565_s19 + $0x48] sm:$0xff] %v1026_v52  ;;  %v904_v62 = vadd.f32 %v1551_v42, %v833_v54  ;;  %v936_v63 = vadd.f32 %v1551_v42, %v865_v55  ;;  %v831_v0 = vmul.f32 %v1546_v40, %v607_v56  ;;  %v1328_v2 = vpop.f32.mrf.mxu0  ;;  %v1360_v3 = vpop.f32.mrf.mxu1 }
 0x10d   : > { %1122 = vst [vmem:[%s1565_s19 + $0x148] sm:$0xff] %v1058_v53  ;;  %v863_v1 = vmul.f32 %v1546_v40, %v735_v57  ;;  %1095 = vst [vmem:[%s1565_s19 + $0x70] sm:$0xff] %v1031_v58  ;;  %v1029_v4 = vmin.f32 %v965_v60, 6.0  ;;  %v836_v6 = vmul.f32 %v1328_v2, %v1546_v40  ;;  %v868_v7 = vmul.f32 %v1360_v3, %v1546_v40 }
 0x10e   : > { %1127 = vst [vmem:[%s1565_s19 + $0x170] sm:$0xff] %v1063_v59  ;;  %v1061_v5 = vmin.f32 %v997_v61, 6.0  ;;  %v968_v8 = vmax.f32 %v904_v62, 0.0  ;;  %v1000_v9 = vmax.f32 %v936_v63, 0.0  ;;  %v902_v10 = vadd.f32 %v1551_v42, %v831_v0  ;;  %v620_v12 = vpop.f32.mrf.mxu0  ;;  %v748_v13 = vpop.f32.mrf.mxu1 }
 0x10f   : > { %v934_v11 = vadd.f32 %v1551_v42, %v863_v1  ;;  %1093 = vst [vmem:[%s1565_s19 + $0x60] sm:$0xff] %v1029_v4  ;;  %v907_v14 = vadd.f32 %v1551_v42, %v836_v6  ;;  %v939_v15 = vadd.f32 %v1551_v42, %v868_v7  ;;  %v834_v16 = vmul.f32 %v1546_v40, %v620_v12 }
 0x110   : > { %1125 = vst [vmem:[%s1565_s19 + $0x160] sm:$0xff] %v1061_v5  ;;  %v866_v17 = vmul.f32 %v1546_v40, %v748_v13  ;;  %v1032_v18 = vmin.f32 %v968_v8, 6.0  ;;  %v1064_v19 = vmin.f32 %v1000_v9, 6.0  ;;  %v966_v20 = vmax.f32 %v902_v10, 0.0  ;;  %v1329_v22 = vpop.f32.mrf.mxu0  ;;  %v1361_v23 = vpop.f32.mrf.mxu1 }
 0x111   : > { %v998_v21 = vmax.f32 %v934_v11, 0.0  ;;  %v971_v24 = vmax.f32 %v907_v14, 0.0  ;;  %v1003_v25 = vmax.f32 %v939_v15, 0.0  ;;  %v905_v26 = vadd.f32 %v1551_v42, %v834_v16 }
 0x112   : > { %v937_v27 = vadd.f32 %v1551_v42, %v866_v17  ;;  %1096 = vst [vmem:[%s1565_s19 + $0x78] sm:$0xff] %v1032_v18  ;;  %1128 = vst [vmem:[%s1565_s19 + $0x178] sm:$0xff] %v1064_v19  ;;  %v1030_v28 = vmin.f32 %v966_v20, 6.0  ;;  %v837_v30 = vmul.f32 %v1329_v22, %v1546_v40  ;;  %v869_v31 = vmul.f32 %v1361_v23, %v1546_v40  ;;  %v623_v32 = vpop.f32.mrf.mxu0  ;;  %v751_v33 = vpop.f32.mrf.mxu1 }
 0x113   : > { %v1062_v29 = vmin.f32 %v998_v21, 6.0  ;;  %v1035_v34 = vmin.f32 %v971_v24, 6.0  ;;  %v1067_v35 = vmin.f32 %v1003_v25, 6.0  ;;  %v969_v36 = vmax.f32 %v905_v26, 0.0 }
 0x114   : > { %v1001_v37 = vmax.f32 %v937_v27, 0.0  ;;  %1094 = vst [vmem:[%s1565_s19 + $0x68] sm:$0xff] %v1030_v28  ;;  %v908_v38 = vadd.f32 %v1551_v42, %v837_v30  ;;  %v940_v39 = vadd.f32 %v1551_v42, %v869_v31  ;;  %v835_v41 = vmul.f32 %v1546_v40, %v623_v32  ;;  %v1332_v44 = vpop.f32.mrf.mxu0  ;;  %v1364_v45 = vpop.f32.mrf.mxu1 }
 0x115   : > { %1126 = vst [vmem:[%s1565_s19 + $0x168] sm:$0xff] %v1062_v29  ;;  %v867_v43 = vmul.f32 %v1546_v40, %v751_v33  ;;  %1099 = vst [vmem:[%s1565_s19 + $0x90] sm:$0xff] %v1035_v34  ;;  %v1033_v46 = vmin.f32 %v969_v36, 6.0  ;;  %v840_v48 = vmul.f32 %v1332_v44, %v1546_v40  ;;  %v872_v49 = vmul.f32 %v1364_v45, %v1546_v40 }
 0x116   : > { %1131 = vst [vmem:[%s1565_s19 + $0x190] sm:$0xff] %v1067_v35  ;;  %v1065_v47 = vmin.f32 %v1001_v37, 6.0  ;;  %v972_v50 = vmax.f32 %v908_v38, 0.0  ;;  %v1004_v51 = vmax.f32 %v940_v39, 0.0  ;;  %v906_v52 = vadd.f32 %v1551_v42, %v835_v41  ;;  %v636_v54 = vpop.f32.mrf.mxu0  ;;  %v764_v55 = vpop.f32.mrf.mxu1 }
 0x117   : > { %v938_v53 = vadd.f32 %v1551_v42, %v867_v43  ;;  %1097 = vst [vmem:[%s1565_s19 + $0x80] sm:$0xff] %v1033_v46  ;;  %v911_v56 = vadd.f32 %v1551_v42, %v840_v48  ;;  %v943_v57 = vadd.f32 %v1551_v42, %v872_v49  ;;  %v838_v58 = vmul.f32 %v1546_v40, %v636_v54 }
 0x118   : > { %1129 = vst [vmem:[%s1565_s19 + $0x180] sm:$0xff] %v1065_v47  ;;  %v870_v59 = vmul.f32 %v1546_v40, %v764_v55  ;;  %v1036_v60 = vmin.f32 %v972_v50, 6.0  ;;  %v1068_v61 = vmin.f32 %v1004_v51, 6.0  ;;  %v970_v62 = vmax.f32 %v906_v52, 0.0  ;;  %v1333_v0 = vpop.f32.mrf.mxu0  ;;  %v1365_v1 = vpop.f32.mrf.mxu1 }
 0x119   : > { %v1002_v63 = vmax.f32 %v938_v53, 0.0  ;;  %v975_v2 = vmax.f32 %v911_v56, 0.0  ;;  %v1007_v3 = vmax.f32 %v943_v57, 0.0  ;;  %v909_v4 = vadd.f32 %v1551_v42, %v838_v58 }
 0x11a   : > { %v941_v5 = vadd.f32 %v1551_v42, %v870_v59  ;;  %1100 = vst [vmem:[%s1565_s19 + $0x98] sm:$0xff] %v1036_v60  ;;  %1132 = vst [vmem:[%s1565_s19 + $0x198] sm:$0xff] %v1068_v61  ;;  %v1034_v6 = vmin.f32 %v970_v62, 6.0  ;;  %v841_v8 = vmul.f32 %v1333_v0, %v1546_v40  ;;  %v873_v9 = vmul.f32 %v1365_v1, %v1546_v40  ;;  %v639_v10 = vpop.f32.mrf.mxu0  ;;  %v767_v11 = vpop.f32.mrf.mxu1 }
 0x11b   : > { %v1066_v7 = vmin.f32 %v1002_v63, 6.0  ;;  %v1039_v12 = vmin.f32 %v975_v2, 6.0  ;;  %v1071_v13 = vmin.f32 %v1007_v3, 6.0  ;;  %v973_v14 = vmax.f32 %v909_v4, 0.0 }
 0x11c   : > { %v1005_v15 = vmax.f32 %v941_v5, 0.0  ;;  %1098 = vst [vmem:[%s1565_s19 + $0x88] sm:$0xff] %v1034_v6  ;;  %v912_v16 = vadd.f32 %v1551_v42, %v841_v8  ;;  %v944_v17 = vadd.f32 %v1551_v42, %v873_v9  ;;  %v839_v18 = vmul.f32 %v1546_v40, %v639_v10  ;;  %v1336_v20 = vpop.f32.mrf.mxu0  ;;  %v1368_v21 = vpop.f32.mrf.mxu1 }
 0x11d   : > { %1130 = vst [vmem:[%s1565_s19 + $0x188] sm:$0xff] %v1066_v7  ;;  %v871_v19 = vmul.f32 %v1546_v40, %v767_v11  ;;  %1103 = vst [vmem:[%s1565_s19 + $0xb0] sm:$0xff] %v1039_v12  ;;  %v1037_v22 = vmin.f32 %v973_v14, 6.0  ;;  %v844_v24 = vmul.f32 %v1336_v20, %v1546_v40  ;;  %v876_v25 = vmul.f32 %v1368_v21, %v1546_v40 }
 0x11e   : > { %1135 = vst [vmem:[%s1565_s19 + $0x1b0] sm:$0xff] %v1071_v13  ;;  %v1069_v23 = vmin.f32 %v1005_v15, 6.0  ;;  %v976_v26 = vmax.f32 %v912_v16, 0.0  ;;  %v1008_v27 = vmax.f32 %v944_v17, 0.0  ;;  %v910_v28 = vadd.f32 %v1551_v42, %v839_v18  ;;  %v652_v30 = vpop.f32.mrf.mxu0  ;;  %v780_v31 = vpop.f32.mrf.mxu1 }
 0x11f   : > { %v942_v29 = vadd.f32 %v1551_v42, %v871_v19  ;;  %1101 = vst [vmem:[%s1565_s19 + $0xa0] sm:$0xff] %v1037_v22  ;;  %v915_v32 = vadd.f32 %v1551_v42, %v844_v24  ;;  %v947_v33 = vadd.f32 %v1551_v42, %v876_v25  ;;  %v842_v34 = vmul.f32 %v1546_v40, %v652_v30 }
 0x120   : > { %1133 = vst [vmem:[%s1565_s19 + $0x1a0] sm:$0xff] %v1069_v23  ;;  %v874_v35 = vmul.f32 %v1546_v40, %v780_v31  ;;  %v1040_v36 = vmin.f32 %v976_v26, 6.0  ;;  %v1072_v37 = vmin.f32 %v1008_v27, 6.0  ;;  %v974_v38 = vmax.f32 %v910_v28, 0.0  ;;  %v1337_v41 = vpop.f32.mrf.mxu0  ;;  %v1369_v43 = vpop.f32.mrf.mxu1 }
 0x121   : > { %v1006_v39 = vmax.f32 %v942_v29, 0.0  ;;  %v979_v44 = vmax.f32 %v915_v32, 0.0  ;;  %v1011_v45 = vmax.f32 %v947_v33, 0.0  ;;  %v913_v46 = vadd.f32 %v1551_v42, %v842_v34 }
 0x122   : > { %v945_v47 = vadd.f32 %v1551_v42, %v874_v35  ;;  %1104 = vst [vmem:[%s1565_s19 + $0xb8] sm:$0xff] %v1040_v36  ;;  %1136 = vst [vmem:[%s1565_s19 + $0x1b8] sm:$0xff] %v1072_v37  ;;  %v1038_v48 = vmin.f32 %v974_v38, 6.0  ;;  %v845_v50 = vmul.f32 %v1337_v41, %v1546_v40  ;;  %v877_v51 = vmul.f32 %v1369_v43, %v1546_v40  ;;  %v655_v52 = vpop.f32.mrf.mxu0  ;;  %v783_v53 = vpop.f32.mrf.mxu1 }
 0x123   : > { %v1070_v49 = vmin.f32 %v1006_v39, 6.0  ;;  %v1043_v54 = vmin.f32 %v979_v44, 6.0  ;;  %v1075_v55 = vmin.f32 %v1011_v45, 6.0  ;;  %v977_v56 = vmax.f32 %v913_v46, 0.0 }
 0x124   : > { %v1009_v57 = vmax.f32 %v945_v47, 0.0  ;;  %1102 = vst [vmem:[%s1565_s19 + $0xa8] sm:$0xff] %v1038_v48  ;;  %v916_v58 = vadd.f32 %v1551_v42, %v845_v50  ;;  %v948_v59 = vadd.f32 %v1551_v42, %v877_v51  ;;  %v843_v60 = vmul.f32 %v1546_v40, %v655_v52  ;;  %v1340_v62 = vpop.f32.mrf.mxu0  ;;  %v1372_v63 = vpop.f32.mrf.mxu1 }
 0x125   : > { %1134 = vst [vmem:[%s1565_s19 + $0x1a8] sm:$0xff] %v1070_v49  ;;  %v875_v61 = vmul.f32 %v1546_v40, %v783_v53  ;;  %1107 = vst [vmem:[%s1565_s19 + $0xd0] sm:$0xff] %v1043_v54  ;;  %v1041_v0 = vmin.f32 %v977_v56, 6.0  ;;  %v848_v2 = vmul.f32 %v1340_v62, %v1546_v40  ;;  %v880_v3 = vmul.f32 %v1372_v63, %v1546_v40 }
 0x126   : > { %1139 = vst [vmem:[%s1565_s19 + $0x1d0] sm:$0xff] %v1075_v55  ;;  %v1073_v1 = vmin.f32 %v1009_v57, 6.0  ;;  %v980_v4 = vmax.f32 %v916_v58, 0.0  ;;  %v1012_v5 = vmax.f32 %v948_v59, 0.0  ;;  %v914_v6 = vadd.f32 %v1551_v42, %v843_v60  ;;  %v668_v8 = vpop.f32.mrf.mxu0  ;;  %v796_v9 = vpop.f32.mrf.mxu1 }
 0x127   : > { %v946_v7 = vadd.f32 %v1551_v42, %v875_v61  ;;  %1105 = vst [vmem:[%s1565_s19 + $0xc0] sm:$0xff] %v1041_v0  ;;  %v919_v10 = vadd.f32 %v1551_v42, %v848_v2  ;;  %v951_v11 = vadd.f32 %v1551_v42, %v880_v3  ;;  %v846_v12 = vmul.f32 %v1546_v40, %v668_v8 }
 0x128   : > { %1137 = vst [vmem:[%s1565_s19 + $0x1c0] sm:$0xff] %v1073_v1  ;;  %v878_v13 = vmul.f32 %v1546_v40, %v796_v9  ;;  %v1044_v14 = vmin.f32 %v980_v4, 6.0  ;;  %v1076_v15 = vmin.f32 %v1012_v5, 6.0  ;;  %v978_v16 = vmax.f32 %v914_v6, 0.0  ;;  %v1341_v18 = vpop.f32.mrf.mxu0  ;;  %v1373_v19 = vpop.f32.mrf.mxu1 }
 0x129   : > { %v1010_v17 = vmax.f32 %v946_v7, 0.0  ;;  %v983_v20 = vmax.f32 %v919_v10, 0.0  ;;  %v1015_v21 = vmax.f32 %v951_v11, 0.0  ;;  %v917_v22 = vadd.f32 %v1551_v42, %v846_v12 }
 0x12a   : > { %v949_v23 = vadd.f32 %v1551_v42, %v878_v13  ;;  %1108 = vst [vmem:[%s1565_s19 + $0xd8] sm:$0xff] %v1044_v14  ;;  %1140 = vst [vmem:[%s1565_s19 + $0x1d8] sm:$0xff] %v1076_v15  ;;  %v1042_v24 = vmin.f32 %v978_v16, 6.0  ;;  %v849_v26 = vmul.f32 %v1341_v18, %v1546_v40  ;;  %v881_v27 = vmul.f32 %v1373_v19, %v1546_v40  ;;  %v671_v28 = vpop.f32.mrf.mxu0  ;;  %v799_v29 = vpop.f32.mrf.mxu1 }
 0x12b   : > { %v1074_v25 = vmin.f32 %v1010_v17, 6.0  ;;  %v1047_v30 = vmin.f32 %v983_v20, 6.0  ;;  %v1079_v31 = vmin.f32 %v1015_v21, 6.0  ;;  %v981_v32 = vmax.f32 %v917_v22, 0.0 }
 0x12c   : > { %v1013_v33 = vmax.f32 %v949_v23, 0.0  ;;  %1106 = vst [vmem:[%s1565_s19 + $0xc8] sm:$0xff] %v1042_v24  ;;  %v920_v34 = vadd.f32 %v1551_v42, %v849_v26  ;;  %v952_v35 = vadd.f32 %v1551_v42, %v881_v27  ;;  %v847_v36 = vmul.f32 %v1546_v40, %v671_v28 }
 0x12d   : > { %1138 = vst [vmem:[%s1565_s19 + $0x1c8] sm:$0xff] %v1074_v25  ;;  %v879_v37 = vmul.f32 %v1546_v40, %v799_v29  ;;  %1111 = vst [vmem:[%s1565_s19 + $0xf0] sm:$0xff] %v1047_v30  ;;  %v1045_v38 = vmin.f32 %v981_v32, 6.0 }
 0x12e   : > { %1143 = vst [vmem:[%s1565_s19 + $0x1f0] sm:$0xff] %v1079_v31  ;;  %v1077_v39 = vmin.f32 %v1013_v33, 6.0  ;;  %v984_v41 = vmax.f32 %v920_v34, 0.0  ;;  %v1016_v43 = vmax.f32 %v952_v35, 0.0  ;;  %v918_v44 = vadd.f32 %v1551_v42, %v847_v36 }
 0x12f   : > { %v950_v45 = vadd.f32 %v1551_v42, %v879_v37  ;;  %1109 = vst [vmem:[%s1565_s19 + $0xe0] sm:$0xff] %v1045_v38 }
 0x130   : > { %1141 = vst [vmem:[%s1565_s19 + $0x1e0] sm:$0xff] %v1077_v39  ;;  %v1048_v46 = vmin.f32 %v984_v41, 6.0  ;;  %v1080_v47 = vmin.f32 %v1016_v43, 6.0  ;;  %v982_v48 = vmax.f32 %v918_v44, 0.0 }
 0x131   : > { %v1014_v49 = vmax.f32 %v950_v45, 0.0 }
 0x132   : > { %1112 = vst [vmem:[%s1565_s19 + $0xf8] sm:$0xff] %v1048_v46  ;;  %1144 = vst [vmem:[%s1565_s19 + $0x1f8] sm:$0xff] %v1080_v47  ;;  %v1046_v40 = vmin.f32 %v982_v48, 6.0 }
 0x133   : > { %v1078_v50 = vmin.f32 %v1014_v49, 6.0 }
 0x134   : > { %1110 = vst [vmem:[%s1565_s19 + $0xe8] sm:$0xff] %v1046_v40 }
 0x135   : > { %1142 = vst [vmem:[%s1565_s19 + $0x1e8] sm:$0xff] %v1078_v50 }
 0x136 PF: > { %s14_s15 = sadd.s32 1, %s1444_s15  }
 0x137   : > { %p11_p4 = scmp.ge.s32.totalorder %s14_s15, 4  }
 0x139   :  { %13 = sbr.rel (!%p11_p4) target bundleno = 1 (0x1), region = 66 }

</bundles_post_ra>
